<compile_context>
chip_gen: v7x
topology: tpu7x:2x2x1
jax: 0.10.0
libtpu: 0.0.40
codegen_flags: <defaults>
</compile_context>

<pallas_src>
import math

import jax
import jax.numpy as jnp
from jax.experimental import pallas as pl
from jax.experimental.pallas import tpu as pltpu


def _triple(v):
    return (v, v, v) if isinstance(v, int) else tuple(v)


def _out_size(sz, k, s, p, d):
    return (sz + 2 * p - d * (k - 1) - 1) // s + 1


def _round_up(v, m):
    return ((v + m - 1) // m) * m


def _compute_coords(offset, kernel_size, stride, padding, dilation, dg):
    """Absolute fractional sampling coordinates -> (N, DG, 3, K, Po), float32."""
    n = offset.shape[0]
    kd, kh, kw = kernel_size
    sd, sh, sw = stride
    pd, ph, pw = padding
    dld, dlh, dlw = dilation
    do, ho, wo = offset.shape[2], offset.shape[3], offset.shape[4]
    k_taps = kd * kh * kw
    po = do * ho * wo
    # channel index = dg*(3*K) + 3*t + comp  ->  reshape (N, DG, K, 3, Po)
    off = offset.reshape(n, dg, k_taps, 3, po).astype(jnp.float32)
    ki, kj, kk = jnp.meshgrid(jnp.arange(kd), jnp.arange(kh), jnp.arange(kw), indexing="ij")
    ki, kj, kk = ki.reshape(-1), kj.reshape(-1), kk.reshape(-1)            # (K,)
    od, oh, ow = jnp.meshgrid(jnp.arange(do), jnp.arange(ho), jnp.arange(wo), indexing="ij")
    od, oh, ow = od.reshape(-1), oh.reshape(-1), ow.reshape(-1)            # (Po,)
    base_d = od[None, :] * sd - pd + ki[:, None] * dld                     # (K, Po)
    base_h = oh[None, :] * sh - ph + kj[:, None] * dlh
    base_w = ow[None, :] * sw - pw + kk[:, None] * dlw
    base = jnp.stack([base_d, base_h, base_w], 0).astype(jnp.float32)      # (3, K, Po)
    return base[None, None] + jnp.transpose(off, (0, 1, 3, 2, 4))          # (N, DG, 3, K, Po)


def _gather_tables(coords, spatial, po_pad):
    """Compressed gather tables (review item 3).

    Returns:
      lin0 : (N, DG, K, 1, Po_pad) int32  -- corner-000 flattened index (unclamped;
             the other 7 corners are base + {0,1,W,...}; exact in flat arithmetic).
      wgt8 : (N, DG, K, 8, Po_pad) bf16   -- validity-folded trilinear weights
             (0 for out-of-bounds corners, so aliased/wrapped indices contribute 0).
    """
    D, H, W = spatial
    cd, ch, cw = coords[:, :, 0], coords[:, :, 1], coords[:, :, 2]         # (N, DG, K, Po)
    d0f, h0f, w0f = jnp.floor(cd), jnp.floor(ch), jnp.floor(cw)
    fd, fh, fw = cd - d0f, ch - h0f, cw - w0f
    d0, h0, w0 = d0f.astype(jnp.int32), h0f.astype(jnp.int32), w0f.astype(jnp.int32)
    base = (d0 * H + h0) * W + w0                                          # (N, DG, K, Po)
    wgts = []
    for a in (0, 1):
        wa = fd if a else 1.0 - fd
        for b in (0, 1):
            wb = fh if b else 1.0 - fh
            for c in (0, 1):
                wc = fw if c else 1.0 - fw
                dd, hh, ww = d0 + a, h0 + b, w0 + c
                valid = ((dd >= 0) & (dd < D) & (hh >= 0) & (hh < H)
                         & (ww >= 0) & (ww < W))
                wgts.append(jnp.where(valid, wa * wb * wc, 0.0))
    wgt = jnp.stack(wgts, axis=3)                                          # (N, DG, K, 8, Po)
    lin = base[:, :, :, None, :]                                           # (N, DG, K, 1, Po)
    pad = po_pad - wgt.shape[-1]
    if pad:
        lin = jnp.pad(lin, ((0, 0),) * 4 + ((0, pad),))
        wgt = jnp.pad(wgt, ((0, 0),) * 4 + ((0, pad),))
    return lin.astype(jnp.int32), wgt.astype(jnp.bfloat16)


def _vmem_limit_bytes(*, DG, n_chunks, s_chunk, Cdg, K, TPo, Co_pad):
    """Generation-aware VMEM budget, validated against the actual block footprint
    (review items 9/10 + correctness concern 1)."""
    x_blk = DG * n_chunks * Cdg * s_chunk * 2          # bf16
    lin_blk = DG * K * 1 * TPo * 4                     # int32
    wgt_blk = DG * K * 8 * TPo * 2                     # bf16
    w_blk = DG * K * Co_pad * Cdg * 2                  # bf16
    b_blk = max(Co_pad, 8) * 128 * 4                   # padded bias tile
    out_blk = Co_pad * TPo * 4                         # f32
    acc = Co_pad * TPo * 4                             # f32 scratch accumulator
    # sampler / select / partial-sum temporaries headroom
    tmp = 4 * s_chunk * TPo * 4 + 2 * Cdg * TPo * 4 + (2 << 20)
    need = 2 * (x_blk + lin_blk + wgt_blk + w_blk + b_blk + out_blk) + acc + tmp
    try:
        cap = int(getattr(pltpu.get_tpu_info(), "vmem_capacity_bytes", 64 * 1024 * 1024))
    except Exception:  # pragma: no cover -- interpret mode / CPU fallback
        cap = 64 * 1024 * 1024
    limit = int(min(max(need, 32 * 1024 * 1024), 0.9 * cap))
    if need > limit:
        raise ValueError(
            f"deform_conv3d tiling needs ~{need >> 20} MiB VMEM but only "
            f"{limit >> 20} MiB is available on this TPU generation; reduce "
            f"tile_po / s_chunk_max or add S tiling.")
    return limit


def _make_kernel(DG, n_chunks, s_chunk, TPo, Cdg, corner_shifts):
    unroll = True if n_chunks <= 8 else 4

    def kernel(x_ref, lin_ref, wgt_ref, w_ref, b_ref, out_ref, acc_ref):
        k = pl.program_id(2)                       # kernel-tap reduction axis

        @pl.when(k == 0)
        def _init():
            acc_ref[...] = jnp.zeros_like(acc_ref)

        # chunk-invariant row iota for the one-hot trilinear sampler
        iota_sp = jax.lax.broadcasted_iota(jnp.int32, (s_chunk, TPo), 0)

        for dg in range(DG):
            lin0 = lin_ref[dg, k]                              # (1, TPo) int32 base corner
            wgt8 = wgt_ref[dg, k].astype(jnp.float32)          # (8, TPo) folded weights

            def chunk_body(ci, acc_cols, lin0=lin0, wgt8=wgt8, dg=dg):
                lin_c = lin0 - ci * s_chunk                    # rebase into this S chunk
                samp = jnp.where(iota_sp == lin_c + corner_shifts[0], wgt8[0:1, :], 0.0)
                for c in range(1, 8):
                    samp = samp + jnp.where(iota_sp == lin_c + corner_shifts[c],
                                            wgt8[c:c + 1, :], 0.0)
                x_chunk = x_ref[dg, ci]                        # (Cdg, s_chunk) bf16, free view
                return acc_cols + jnp.dot(x_chunk, samp.astype(jnp.bfloat16),
                                          preferred_element_type=jnp.float32)

            cols_dg = jax.lax.fori_loop(0, n_chunks, chunk_body,
                                        jnp.zeros((Cdg, TPo), jnp.float32),
                                        unroll=unroll)         # (Cdg, TPo) f32

            # single block-diagonal weight GEMM per dg per tap, f32 accumulate
            acc_ref[...] += jnp.dot(w_ref[dg, k], cols_dg.astype(jnp.bfloat16),
                                    preferred_element_type=jnp.float32)

        @pl.when(k == pl.num_programs(2) - 1)
        def _finalize():
            out_ref[...] = (acc_ref[...] + b_ref[...]).astype(out_ref.dtype)

    return kernel


def deform_conv3d(x, offset, weight, bias, *, stride, padding, dilation=1,
                  groups=1, deformable_groups=1, tile_po=256, s_chunk_max=512):
    stride, padding, dilation = _triple(stride), _triple(padding), _triple(dilation)
    N, C, D, H, W = x.shape
    C_out, Cg, kd, kh, kw = weight.shape
    K = kd * kh * kw
    DG = deformable_groups
    assert offset.shape[1] == 3 * DG * K, "offset channel num incorrect"
    assert C % groups == 0 and C_out % groups == 0 and C // groups == Cg
    assert C % DG == 0
    assert tile_po % 128 == 0 and s_chunk_max % 8 == 0
    Do = _out_size(D, kd, stride[0], padding[0], dilation[0])
    Ho = _out_size(H, kh, stride[1], padding[1], dilation[1])
    Wo = _out_size(W, kw, stride[2], padding[2], dilation[2])
    assert tuple(offset.shape[2:]) == (Do, Ho, Wo)

    S, Po = D * H * W, Do * Ho * Wo
    Cog, Cdg = C_out // groups, C // DG
    Co_pad = _round_up(C_out, 8)

    TPo = min(tile_po, _round_up(Po, 128))            # lane-dense output tile
    n_po = (Po + TPo - 1) // TPo
    Po_pad = n_po * TPo

    s_chunk = min(s_chunk_max, _round_up(S, 8))       # sampler S-chunk (review item 4)
    n_chunks = (S + s_chunk - 1) // s_chunk
    S_pad = n_chunks * s_chunk

    # ---- wrapper-side precompute (cheap XLA elementwise, overlaps the kernel)
    coords = _compute_coords(offset, (kd, kh, kw), stride, padding, dilation, DG)
    lin0, wgt8 = _gather_tables(coords, (D, H, W), Po_pad)

    # x laid out as (N, DG, n_chunks, Cdg, s_chunk): every per-dg / per-chunk
    # access in the kernel is a leading-axis index (no unaligned sublane slice).
    x_g = x.reshape(N, DG, Cdg, S)
    if S_pad != S:
        x_g = jnp.pad(x_g, ((0, 0), (0, 0), (0, 0), (0, S_pad - S)))
    x_g = jnp.transpose(x_g.reshape(N, DG, Cdg, n_chunks, s_chunk),
                        (0, 1, 3, 2, 4)).astype(jnp.bfloat16)

    # Block-diagonal per-tap weight (groups folded into one GEMM), split by dg.
    w_tap = jnp.transpose(weight.reshape(C_out, Cg, K), (2, 0, 1))          # (K, C_out, Cg)
    if groups == 1:
        w_bd = w_tap
    else:
        w_tap = w_tap.reshape(K, groups, Cog, Cg)
        rows = []
        for g in range(groups):
            blocks = [w_tap[:, g] if gg == g
                      else jnp.zeros((K, Cog, Cg), w_tap.dtype) for gg in range(groups)]
            rows.append(jnp.concatenate(blocks, axis=2))                    # (K, Cog, C)
        w_bd = jnp.concatenate(rows, axis=1)                                # (K, C_out, C)
    if Co_pad != C_out:
        w_bd = jnp.pad(w_bd, ((0, 0), (0, Co_pad - C_out), (0, 0)))
    w_dg = jnp.transpose(w_bd.reshape(K, Co_pad, DG, Cdg),
                         (2, 0, 1, 3)).astype(jnp.bfloat16)                 # (DG, K, Co_pad, Cdg)

    b_col = bias.astype(jnp.float32)
    if Co_pad != C_out:
        b_col = jnp.pad(b_col, (0, Co_pad - C_out))
    b_col = b_col[:, None]                                                  # (Co_pad, 1)

    # corner flat-index shifts (compile-time constants, exact in flat arithmetic)
    corner_shifts = [a * H * W + b * W + c for a in (0, 1) for b in (0, 1) for c in (0, 1)]

    kernel = _make_kernel(DG, n_chunks, s_chunk, TPo, Cdg, corner_shifts)
    grid = (N, n_po, K)

    out = pl.pallas_call(
        kernel,
        out_shape=jax.ShapeDtypeStruct((N, Co_pad, Po_pad), jnp.float32),
        grid_spec=pltpu.PrefetchScalarGridSpec(
            num_scalar_prefetch=0,
            grid=grid,
            in_specs=[
                # x: block index depends only on n -> DMA'd once per sample
                pl.BlockSpec((None, DG, n_chunks, Cdg, s_chunk),
                             lambda n, p, k: (n, 0, 0, 0, 0)),
                # gather tables: all K taps of the (n, p) tile in one DMA each
                pl.BlockSpec((None, DG, K, 1, TPo), lambda n, p, k: (n, 0, 0, 0, p)),
                pl.BlockSpec((None, DG, K, 8, TPo), lambda n, p, k: (n, 0, 0, 0, p)),
                # weights / bias: fully resident (constant block index)
                pl.BlockSpec((DG, K, Co_pad, Cdg), lambda n, p, k: (0, 0, 0, 0)),
                pl.BlockSpec((Co_pad, 1), lambda n, p, k: (0, 0)),
            ],
            out_specs=pl.BlockSpec((None, Co_pad, TPo), lambda n, p, k: (n, 0, p)),
            scratch_shapes=[pltpu.VMEM((Co_pad, TPo), jnp.float32)],
        ),
        compiler_params=pltpu.CompilerParams(
            dimension_semantics=("parallel", "parallel", "arbitrary"),
            vmem_limit_bytes=_vmem_limit_bytes(
                DG=DG, n_chunks=n_chunks, s_chunk=s_chunk, Cdg=Cdg, K=K,
                TPo=TPo, Co_pad=Co_pad),
        ),
    )(x_g, lin0, wgt8, w_dg, b_col)

    out = out[:, :C_out, :Po]                                   # drop padding
    return out.reshape(N, C_out, Do, Ho, Wo)


def _reference(x, offset, weight, bias, stride, padding, dilation, groups, DG):
    """Pure-JAX f32 reference (same trilinear / boundary semantics)."""
    N, C, D, H, W = x.shape
    C_out, Cg, kd, kh, kw = weight.shape
    K = kd * kh * kw
    Do, Ho, Wo = offset.shape[2], offset.shape[3], offset.shape[4]
    S, Po = D * H * W, Do * Ho * Wo
    Cdg = C // DG
    coords = _compute_coords(offset, (kd, kh, kw), stride, padding, dilation, DG)
    cd, ch, cw = coords[:, :, 0], coords[:, :, 1], coords[:, :, 2]          # (N, DG, K, Po)
    d0, h0, w0 = jnp.floor(cd), jnp.floor(ch), jnp.floor(cw)
    fd, fh, fw = cd - d0, ch - h0, cw - w0
    d0, h0, w0 = d0.astype(jnp.int32), h0.astype(jnp.int32), w0.astype(jnp.int32)
    x_g = x.reshape(N, DG, Cdg, S).astype(jnp.float32)
    cols = jnp.zeros((N, DG, Cdg, K * Po), jnp.float32)
    for a in (0, 1):
        for b in (0, 1):
            for c in (0, 1):
                dd, hh, ww = d0 + a, h0 + b, w0 + c
                valid = (dd >= 0) & (dd < D) & (hh >= 0) & (hh < H) & (ww >= 0) & (ww < W)
                wgt = (fd if a else 1 - fd) * (fh if b else 1 - fh) * (fw if c else 1 - fw)
                wgt = jnp.where(valid, wgt, 0.0)
                lin = jnp.where(valid, (dd * H + hh) * W + ww, 0)
                gath = jnp.take_along_axis(x_g, lin.reshape(N, DG, 1, K * Po), axis=3)
                cols = cols + wgt.reshape(N, DG, 1, K * Po) * gath
    cols = cols.reshape(N, C, K, Po)
    w_k = weight.reshape(C_out, Cg, K)
    Cog, Cgrp = C_out // groups, C // groups
    outs = []
    for g in range(groups):
        outs.append(jnp.einsum("ock,nckp->nop", w_k[g * Cog:(g + 1) * Cog],
                               cols[:, g * Cgrp:(g + 1) * Cgrp],
                               preferred_element_type=jnp.float32))
    out = jnp.concatenate(outs, axis=1) + bias[None, :, None]
    return out.reshape(N, C_out, Do, Ho, Wo)


def _run_case(key, *, N, C_in, C_out, spatial, ksize, stride, padding,
              dilation, groups, DG, tol):
    k1, k2, k3, k4 = jax.random.split(key, 4)
    D, H, W = spatial
    kd, kh, kw = _triple(ksize)
    K = kd * kh * kw
    st, pd_, dl = _triple(stride), _triple(padding), _triple(dilation)
    Do = _out_size(D, kd, st[0], pd_[0], dl[0])
    Ho = _out_size(H, kh, st[1], pd_[1], dl[1])
    Wo = _out_size(W, kw, st[2], pd_[2], dl[2])

    # deterministic reset_parameters(): kaiming_uniform_(a=sqrt(5)) == U(-1/sqrt(fan_in), +)
    fan_in = (C_in // groups) * K
    bound = 1.0 / math.sqrt(fan_in)
    weight = jax.random.uniform(k1, (C_out, C_in // groups, kd, kh, kw),
                                jnp.float32, -bound, bound)
    bias = jax.random.uniform(k2, (C_out,), jnp.float32, -bound, bound)
    x = jax.random.normal(k3, (N, C_in, D, H, W), jnp.float32)
    offset = 1.5 * jax.random.normal(k4, (N, 3 * DG * K, Do, Ho, Wo), jnp.float32)

    out = deform_conv3d(x, offset, weight, bias, stride=stride, padding=padding,
                        dilation=dilation, groups=groups, deformable_groups=DG)
    out = jax.block_until_ready(out)
    assert out.shape == (N, C_out, Do, Ho, Wo)

    ref = _reference(x, offset, weight, bias, st, pd_, dl, groups, DG)
    err = float(jnp.max(jnp.abs(out - ref)))
    # tolerance sized for bf16 MXU operands vs. the f32 reference
    assert err < tol, f"mismatch vs reference: {err}"


if __name__ == "__main__":
    key = jax.random.PRNGKey(0)
    ka, kb = jax.random.split(key)
    # case 1: typical 3x3x3 / pad 1 config (TPo=256 path, single S chunk)
    _run_case(ka, N=2, C_in=4, C_out=8, spatial=(6, 6, 6), ksize=3, stride=1,
              padding=1, dilation=1, groups=1, DG=1, tol=3e-2)
    # case 2: exercises groups / deformable_groups / stride and the C_out & Po padding paths
    _run_case(kb, N=1, C_in=8, C_out=6, spatial=(5, 5, 5), ksize=2, stride=2,
              padding=0, dilation=1, groups=2, DG=2, tol=3e-2)
    print("KERNEL_OK")
</pallas_src>

<mosaic_0001>
module attributes {stable_mosaic.version = 11 : i64} {
  func.func @kernel(%arg0: i32, %arg1: i32, %arg2: i32, %arg3: memref<1x1x1x4x216xbf16, #tpu.memory_space<vmem>>, %arg4: memref<1x1x27x1x256xi32, #tpu.memory_space<vmem>>, %arg5: memref<1x1x27x8x256xbf16, #tpu.memory_space<vmem>>, %arg6: memref<1x27x8x4xbf16, #tpu.memory_space<vmem>>, %arg7: memref<8x1xf32, #tpu.memory_space<vmem>>, %arg8: memref<1x8x256xf32, #tpu.memory_space<vmem>>, %arg9: memref<8x256xf32, #tpu.memory_space<vmem>>) attributes {dimension_semantics = [#tpu.dimension_semantics<parallel>, #tpu.dimension_semantics<parallel>, #tpu.dimension_semantics<arbitrary>], iteration_bounds = array<i64: 2, 1, 27>, scalar_prefetch = 0 : i64, scratch_operands = 1 : i64, tpu.core_type = #tpu.core_type<tc>, window_params = [{transform_indices = @transform_0, window_bounds = array<i64: 1, 1, 1, 4, 216>}, {transform_indices = @transform_1, window_bounds = array<i64: 1, 1, 27, 1, 256>}, {transform_indices = @transform_2, window_bounds = array<i64: 1, 1, 27, 8, 256>}, {pipeline_mode = #tpu.pipeline_mode<synchronous>, transform_indices = @transform_3, window_bounds = array<i64: 1, 27, 8, 4>}, {pipeline_mode = #tpu.pipeline_mode<synchronous>, transform_indices = @transform_4, window_bounds = array<i64: 8, 1>}, {transform_indices = @transform_5, window_bounds = array<i64: 1, 8, 256>}]} {
    %c0_i32 = arith.constant 0 : i32
    %0 = arith.cmpi eq, %arg2, %c0_i32 : i32
    %1 = arith.extui %0 : i1 to i32
    %c0_i32_0 = arith.constant 0 : i32
    %2 = arith.cmpi ne, %1, %c0_i32_0 : i32
    scf.if %2 {
      %cst_33 = arith.constant 0.000000e+00 : f32
      %111 = vector.broadcast %cst_33 : f32 to vector<8x256xf32>
      %c0_34 = arith.constant 0 : index
      %c0_35 = arith.constant 0 : index
      %112 = vector.load %arg9[%c0_34, %c0_35] : memref<8x256xf32, #tpu.memory_space<vmem>>, vector<8x256xf32>
      tpu.vector_store %arg9[%c0_34, %c0_35], %111 {strides = array<i32>} : memref<8x256xf32, #tpu.memory_space<vmem>>, vector<8x256xf32>,
    } else {
    }
    %3 = tpu.iota {dimensions = array<i32: 0>} : vector<216x256xi32>
    %c0 = arith.constant 0 : index
    %c0_1 = arith.constant 0 : index
    %4 = arith.index_cast %arg2 : i32 to index
    %c0_2 = arith.constant 0 : index
    %c0_3 = arith.constant 0 : index
    %5 = vector.load %arg4[%c0, %c0_1, %4, %c0_2, %c0_3] : memref<1x1x27x1x256xi32, #tpu.memory_space<vmem>>, vector<1x1x1x1x256xi32>
    %6 = vector.shape_cast %5 : vector<1x1x1x1x256xi32> to vector<1x256xi32>
    %c0_4 = arith.constant 0 : index
    %c0_5 = arith.constant 0 : index
    %7 = arith.index_cast %arg2 : i32 to index
    %c0_6 = arith.constant 0 : index
    %c0_7 = arith.constant 0 : index
    %8 = vector.load %arg5[%c0_4, %c0_5, %7, %c0_6, %c0_7] : memref<1x1x27x8x256xbf16, #tpu.memory_space<vmem>>, vector<1x1x1x8x256xbf16>
    %9 = vector.shape_cast %8 : vector<1x1x1x8x256xbf16> to vector<8x256xbf16>
    %10 = arith.extf %9 : vector<8x256xbf16> to vector<8x256xf32>
    %cst = arith.constant 0.000000e+00 : f32
    %11 = vector.broadcast %cst : f32 to vector<4x256xf32>
    %c0_i32_8 = arith.constant 0 : i32
    %c216_i32 = arith.constant 216 : i32
    %12 = arith.muli %c0_i32_8, %c216_i32 : i32
    %13 = vector.broadcast %12 : i32 to vector<1x256xi32>
    %14 = arith.subi %6, %13 : vector<1x256xi32>
    %c0_i32_9 = arith.constant 0 : i32
    %15 = vector.broadcast %c0_i32_9 : i32 to vector<1x256xi32>
    %16 = arith.addi %14, %15 : vector<1x256xi32>
    %17 = vector.broadcast %16 : vector<1x256xi32> to vector<216x256xi32>
    %18 = arith.cmpi eq, %3, %17 : vector<216x256xi32>
    %19 = vector.extract_strided_slice %10 {offsets = [0, 0], sizes = [1, 256], strides = [1, 1]} : vector<8x256xf32> to vector<1x256xf32>
    %cst_10 = arith.constant 0.000000e+00 : f32
    %20 = vector.shape_cast %19 : vector<1x256xf32> to vector<1x256xf32>
    %21 = vector.broadcast %20 : vector<1x256xf32> to vector<216x256xf32>
    %22 = vector.broadcast %cst_10 : f32 to vector<216x256xf32>
    %23 = arith.select %18, %21, %22 : vector<216x256xi1>, vector<216x256xf32>
    %c1_i32 = arith.constant 1 : i32
    %24 = vector.broadcast %c1_i32 : i32 to vector<1x256xi32>
    %25 = arith.addi %14, %24 : vector<1x256xi32>
    %26 = vector.broadcast %25 : vector<1x256xi32> to vector<216x256xi32>
    %27 = arith.cmpi eq, %3, %26 : vector<216x256xi32>
    %28 = vector.extract_strided_slice %10 {offsets = [1, 0], sizes = [1, 256], strides = [1, 1]} : vector<8x256xf32> to vector<1x256xf32>
    %cst_11 = arith.constant 0.000000e+00 : f32
    %29 = vector.shape_cast %28 : vector<1x256xf32> to vector<1x256xf32>
    %30 = vector.broadcast %29 : vector<1x256xf32> to vector<216x256xf32>
    %31 = vector.broadcast %cst_11 : f32 to vector<216x256xf32>
    %32 = arith.select %27, %30, %31 : vector<216x256xi1>, vector<216x256xf32>
    %33 = arith.addf %23, %32 : vector<216x256xf32>
    %c6_i32 = arith.constant 6 : i32
    %34 = vector.broadcast %c6_i32 : i32 to vector<1x256xi32>
    %35 = arith.addi %14, %34 : vector<1x256xi32>
    %36 = vector.broadcast %35 : vector<1x256xi32> to vector<216x256xi32>
    %37 = arith.cmpi eq, %3, %36 : vector<216x256xi32>
    %38 = vector.extract_strided_slice %10 {offsets = [2, 0], sizes = [1, 256], strides = [1, 1]} : vector<8x256xf32> to vector<1x256xf32>
    %cst_12 = arith.constant 0.000000e+00 : f32
    %39 = vector.shape_cast %38 : vector<1x256xf32> to vector<1x256xf32>
    %40 = vector.broadcast %39 : vector<1x256xf32> to vector<216x256xf32>
    %41 = vector.broadcast %cst_12 : f32 to vector<216x256xf32>
    %42 = arith.select %37, %40, %41 : vector<216x256xi1>, vector<216x256xf32>
    %43 = arith.addf %33, %42 : vector<216x256xf32>
    %c7_i32 = arith.constant 7 : i32
    %44 = vector.broadcast %c7_i32 : i32 to vector<1x256xi32>
    %45 = arith.addi %14, %44 : vector<1x256xi32>
    %46 = vector.broadcast %45 : vector<1x256xi32> to vector<216x256xi32>
    %47 = arith.cmpi eq, %3, %46 : vector<216x256xi32>
    %48 = vector.extract_strided_slice %10 {offsets = [3, 0], sizes = [1, 256], strides = [1, 1]} : vector<8x256xf32> to vector<1x256xf32>
    %cst_13 = arith.constant 0.000000e+00 : f32
    %49 = vector.shape_cast %48 : vector<1x256xf32> to vector<1x256xf32>
    %50 = vector.broadcast %49 : vector<1x256xf32> to vector<216x256xf32>
    %51 = vector.broadcast %cst_13 : f32 to vector<216x256xf32>
    %52 = arith.select %47, %50, %51 : vector<216x256xi1>, vector<216x256xf32>
    %53 = arith.addf %43, %52 : vector<216x256xf32>
    %c36_i32 = arith.constant 36 : i32
    %54 = vector.broadcast %c36_i32 : i32 to vector<1x256xi32>
    %55 = arith.addi %14, %54 : vector<1x256xi32>
    %56 = vector.broadcast %55 : vector<1x256xi32> to vector<216x256xi32>
    %57 = arith.cmpi eq, %3, %56 : vector<216x256xi32>
    %58 = vector.extract_strided_slice %10 {offsets = [4, 0], sizes = [1, 256], strides = [1, 1]} : vector<8x256xf32> to vector<1x256xf32>
    %cst_14 = arith.constant 0.000000e+00 : f32
    %59 = vector.shape_cast %58 : vector<1x256xf32> to vector<1x256xf32>
    %60 = vector.broadcast %59 : vector<1x256xf32> to vector<216x256xf32>
    %61 = vector.broadcast %cst_14 : f32 to vector<216x256xf32>
    %62 = arith.select %57, %60, %61 : vector<216x256xi1>, vector<216x256xf32>
    %63 = arith.addf %53, %62 : vector<216x256xf32>
    %c37_i32 = arith.constant 37 : i32
    %64 = vector.broadcast %c37_i32 : i32 to vector<1x256xi32>
    %65 = arith.addi %14, %64 : vector<1x256xi32>
    %66 = vector.broadcast %65 : vector<1x256xi32> to vector<216x256xi32>
    %67 = arith.cmpi eq, %3, %66 : vector<216x256xi32>
    %68 = vector.extract_strided_slice %10 {offsets = [5, 0], sizes = [1, 256], strides = [1, 1]} : vector<8x256xf32> to vector<1x256xf32>
    %cst_15 = arith.constant 0.000000e+00 : f32
    %69 = vector.shape_cast %68 : vector<1x256xf32> to vector<1x256xf32>
    %70 = vector.broadcast %69 : vector<1x256xf32> to vector<216x256xf32>
    %71 = vector.broadcast %cst_15 : f32 to vector<216x256xf32>
    %72 = arith.select %67, %70, %71 : vector<216x256xi1>, vector<216x256xf32>
    %73 = arith.addf %63, %72 : vector<216x256xf32>
    %c42_i32 = arith.constant 42 : i32
    %74 = vector.broadcast %c42_i32 : i32 to vector<1x256xi32>
    %75 = arith.addi %14, %74 : vector<1x256xi32>
    %76 = vector.broadcast %75 : vector<1x256xi32> to vector<216x256xi32>
    %77 = arith.cmpi eq, %3, %76 : vector<216x256xi32>
    %78 = vector.extract_strided_slice %10 {offsets = [6, 0], sizes = [1, 256], strides = [1, 1]} : vector<8x256xf32> to vector<1x256xf32>
    %cst_16 = arith.constant 0.000000e+00 : f32
    %79 = vector.shape_cast %78 : vector<1x256xf32> to vector<1x256xf32>
    %80 = vector.broadcast %79 : vector<1x256xf32> to vector<216x256xf32>
    %81 = vector.broadcast %cst_16 : f32 to vector<216x256xf32>
    %82 = arith.select %77, %80, %81 : vector<216x256xi1>, vector<216x256xf32>
    %83 = arith.addf %73, %82 : vector<216x256xf32>
    %c43_i32 = arith.constant 43 : i32
    %84 = vector.broadcast %c43_i32 : i32 to vector<1x256xi32>
    %85 = arith.addi %14, %84 : vector<1x256xi32>
    %86 = vector.broadcast %85 : vector<1x256xi32> to vector<216x256xi32>
    %87 = arith.cmpi eq, %3, %86 : vector<216x256xi32>
    %88 = vector.extract_strided_slice %10 {offsets = [7, 0], sizes = [1, 256], strides = [1, 1]} : vector<8x256xf32> to vector<1x256xf32>
    %cst_17 = arith.constant 0.000000e+00 : f32
    %89 = vector.shape_cast %88 : vector<1x256xf32> to vector<1x256xf32>
    %90 = vector.broadcast %89 : vector<1x256xf32> to vector<216x256xf32>
    %91 = vector.broadcast %cst_17 : f32 to vector<216x256xf32>
    %92 = arith.select %87, %90, %91 : vector<216x256xi1>, vector<216x256xf32>
    %93 = arith.addf %83, %92 : vector<216x256xf32>
    %c0_18 = arith.constant 0 : index
    %c0_19 = arith.constant 0 : index
    %94 = arith.index_cast %c0_i32_8 : i32 to index
    %c0_20 = arith.constant 0 : index
    %c0_21 = arith.constant 0 : index
    %95 = vector.load %arg3[%c0_18, %c0_19, %94, %c0_20, %c0_21] : memref<1x1x1x4x216xbf16, #tpu.memory_space<vmem>>, vector<1x1x1x4x216xbf16>
    %96 = vector.shape_cast %95 : vector<1x1x1x4x216xbf16> to vector<4x216xbf16>
    %97 = arith.truncf %93 : vector<216x256xf32> to vector<216x256xbf16>
    %cst_22 = arith.constant dense<0.000000e+00> : vector<4x256xf32>
    %98 = tpu.matmul %96, %97, %cst_22 {dimension_numbers = #tpu.dot_dimension_numbers<[1], [0], [0], [1], [0, 0, 1, 1], [], []>} : vector<4x216xbf16>, vector<216x256xbf16>, vector<4x256xf32> -> vector<4x256xf32>
    %99 = arith.addf %11, %98 : vector<4x256xf32>
    %c1_i32_23 = arith.constant 1 : i32
    %c0_24 = arith.constant 0 : index
    %c0_25 = arith.constant 0 : index
    %100 = vector.load %arg9[%c0_24, %c0_25] : memref<8x256xf32, #tpu.memory_space<vmem>>, vector<8x256xf32>
    %c0_26 = arith.constant 0 : index
    %101 = arith.index_cast %arg2 : i32 to index
    %c0_27 = arith.constant 0 : index
    %c0_28 = arith.constant 0 : index
    %102 = vector.load %arg6[%c0_26, %101, %c0_27, %c0_28] : memref<1x27x8x4xbf16, #tpu.memory_space<vmem>>, vector<1x1x8x4xbf16>
    %103 = vector.shape_cast %102 : vector<1x1x8x4xbf16> to vector<8x4xbf16>
    %104 = arith.truncf %99 : vector<4x256xf32> to vector<4x256xbf16>
    %cst_29 = arith.constant dense<0.000000e+00> : vector<8x256xf32>
    %105 = tpu.matmul %103, %104, %cst_29 {dimension_numbers = #tpu.dot_dimension_numbers<[1], [0], [0], [1], [0, 0, 1, 1], [], []>} : vector<8x4xbf16>, vector<4x256xbf16>, vector<8x256xf32> -> vector<8x256xf32>
    %106 = arith.addf %100, %105 : vector<8x256xf32>
    %c0_30 = arith.constant 0 : index
    %c0_31 = arith.constant 0 : index
    %107 = vector.load %arg9[%c0_30, %c0_31] : memref<8x256xf32, #tpu.memory_space<vmem>>, vector<8x256xf32>
    tpu.vector_store %arg9[%c0_30, %c0_31], %106 {strides = array<i32>} : memref<8x256xf32, #tpu.memory_space<vmem>>, vector<8x256xf32>,
    %c26_i32 = arith.constant 26 : i32
    %108 = arith.cmpi eq, %arg2, %c26_i32 : i32
    %109 = arith.extui %108 : i1 to i32
    %c0_i32_32 = arith.constant 0 : i32
    %110 = arith.cmpi ne, %109, %c0_i32_32 : i32
    scf.if %110 {
      %c0_33 = arith.constant 0 : index
      %c0_34 = arith.constant 0 : index
      %111 = vector.load %arg9[%c0_33, %c0_34] : memref<8x256xf32, #tpu.memory_space<vmem>>, vector<8x256xf32>
      %c0_35 = arith.constant 0 : index
      %c0_36 = arith.constant 0 : index
      %112 = vector.load %arg7[%c0_35, %c0_36] : memref<8x1xf32, #tpu.memory_space<vmem>>, vector<8x1xf32>
      %113 = vector.broadcast %112 : vector<8x1xf32> to vector<8x256xf32>
      %114 = arith.addf %111, %113 : vector<8x256xf32>
      %c0_37 = arith.constant 0 : index
      %c0_38 = arith.constant 0 : index
      %c0_39 = arith.constant 0 : index
      %115 = vector.load %arg8[%c0_37, %c0_38, %c0_39] : memref<1x8x256xf32, #tpu.memory_space<vmem>>, vector<1x8x256xf32>
      %116 = vector.shape_cast %115 : vector<1x8x256xf32> to vector<8x256xf32>
      %117 = vector.shape_cast %114 : vector<8x256xf32> to vector<1x8x256xf32>
      tpu.vector_store %arg8[%c0_37, %c0_38, %c0_39], %117 {strides = array<i32>} : memref<1x8x256xf32, #tpu.memory_space<vmem>>, vector<1x8x256xf32>,
    } else {
    }
    return
  }
  func.func @transform_0(%arg0: i32, %arg1: i32, %arg2: i32) -> (i32, i32, i32, i32, i32) {
    %c0_i32 = arith.constant 0 : i32
    %c0_i32_0 = arith.constant 0 : i32
    %c0_i32_1 = arith.constant 0 : i32
    %c0_i32_2 = arith.constant 0 : i32
    %c0_i32_3 = arith.constant 0 : i32
    return %arg0, %c0_i32, %c0_i32_0, %c0_i32_1, %c0_i32_2 : i32, i32, i32, i32, i32
  }
  func.func @transform_1(%arg0: i32, %arg1: i32, %arg2: i32) -> (i32, i32, i32, i32, i32) {
    %c0_i32 = arith.constant 0 : i32
    %c0_i32_0 = arith.constant 0 : i32
    %c0_i32_1 = arith.constant 0 : i32
    %c0_i32_2 = arith.constant 0 : i32
    return %arg0, %c0_i32, %c0_i32_0, %c0_i32_1, %arg1 : i32, i32, i32, i32, i32
  }
  func.func @transform_2(%arg0: i32, %arg1: i32, %arg2: i32) -> (i32, i32, i32, i32, i32) {
    %c0_i32 = arith.constant 0 : i32
    %c0_i32_0 = arith.constant 0 : i32
    %c0_i32_1 = arith.constant 0 : i32
    %c0_i32_2 = arith.constant 0 : i32
    return %arg0, %c0_i32, %c0_i32_0, %c0_i32_1, %arg1 : i32, i32, i32, i32, i32
  }
  func.func @transform_3(%arg0: i32, %arg1: i32, %arg2: i32) -> (i32, i32, i32, i32) {
    %c0_i32 = arith.constant 0 : i32
    %c0_i32_0 = arith.constant 0 : i32
    %c0_i32_1 = arith.constant 0 : i32
    %c0_i32_2 = arith.constant 0 : i32
    %c0_i32_3 = arith.constant 0 : i32
    return %c0_i32, %c0_i32_0, %c0_i32_1, %c0_i32_2 : i32, i32, i32, i32
  }
  func.func @transform_4(%arg0: i32, %arg1: i32, %arg2: i32) -> (i32, i32) {
    %c0_i32 = arith.constant 0 : i32
    %c0_i32_0 = arith.constant 0 : i32
    %c0_i32_1 = arith.constant 0 : i32
    return %c0_i32, %c0_i32_0 : i32, i32
  }
  func.func @transform_5(%arg0: i32, %arg1: i32, %arg2: i32) -> (i32, i32, i32) {
    %c0_i32 = arith.constant 0 : i32
    %c0_i32_0 = arith.constant 0 : i32
    return %arg0, %c0_i32, %arg1 : i32, i32, i32
  }
}

</mosaic_0001>

<bundles_post_ra>
// kernel: tpu_custom_call.1
= control target key start
LH: loop header
LB: loop body
LE: loop exit
PB: predicated region body
PF: predicated region fallthrough
CT: control target
= control target key end

     0   :  { %s4103_s0 = inlined_call_operand.vmem [shape: bf16[2,1,1,4,216], index: 0, kind: input, shape index: {}]   ;;  %s4104_s1 = inlined_call_operand.vmem [shape: s32[2,1,27,1,256], index: 1, kind: input, shape index: {}]   ;;  %s4105_s2 = inlined_call_operand.hbm [shape: bf16[2,1,27,8,256], index: 2, kind: input, shape index: {}]   ;;  %s4106_s3 = inlined_call_operand.vmem [shape: bf16[1,27,8,4], index: 3, kind: input, shape index: {}]   ;;  %s4107_s4 = inlined_call_operand.vmem [shape: f32[8,1], index: 4, kind: input, shape index: {}]   ;;  %s4108_s5 = inlined_call_operand.hbm [shape: f32[2,8,256], index: 5, kind: output, shape index: {}]  }
   0x1   :  { %4111 = sst [smem:[#allocation11_spill]] %s4105_s2 }
   0x2   :  { %10 = vsyncpa [#allocation4], 0 }
   0x3   :  { %12 = vsyncpa [#allocation4 + $0x1], 0 }
   0x4   :  { %13 = vsyncpa [#allocation5], 0 }
   0x5   :  { %15 = vsyncpa [#allocation5 + $0x1], 0  ;;  %s2335_s18 = smov 0   ;;  %s2337_s19 = smov 0  }
   0x6   :  { %s2339_s20 = smov 0   ;;  %s2341_s21 = smov 0  }
   0x7   :  { %s2343_s22 = smov 0   ;;  %s2345_s23 = smov 0  }
   0x8   :  { %s2347_s24 = smov 0   ;;  %s2349_s25 = smov 0  }
   0x9 LB: > { %s2053_s26 = sadd.s32 4294967295, %s2296_s25   ;;  %s2054_s27 = sadd.s32 4294967294, %s2296_s25   ;;  %s2296_s25 = sphi %s2349_s25, %s21_s25   ;;  %s2292_s24 = sphi %s2347_s24, %s4131_s24   ;;  %s2288_s23 = sphi %s2345_s23, %s4130_s23   ;;  %s2284_s22 = sphi %s2343_s22, %s4129_s22   ;;  %s2280_s21 = sphi %s2341_s21, %s4128_s21   ;;  %s2276_s20 = sphi %s2339_s20, %s4127_s20   ;;  %s2272_s19 = sphi %s2337_s19, %s4126_s19   ;;  %s2268_s18 = sphi %s2335_s18, %s4125_s18  }
   0xa   : > { %s33_s28 = sadd.s32 1, %s2288_s23  ;;  %s40_s29 = sadd.s32 1, %s2292_s24 }
   0xb   : > { %p34_p0 = scmp.ge.s32.totalorder %s33_s28, 27  ;;  %s103_s30 = sadd.s32 1, %s2276_s20 }
   0xc   : > { %p110_p1 = scmp.ne.s32.totalorder %s2276_s20, %s2272_s19  ;;  %p111_p2 = scmp.eq.s32.totalorder %s2296_s25, 0 }
   0xd   : > { %s4133_s28 = smov (%p34_p0, %s33_s28), 0  ;;  %s4135_s29 = smov (!%p34_p0, %s40_s29), %s2292_s24 }
   0xe   : > { %4112 = sst [smem:[#allocation9_spill]] %s4133_s28  ;;  %p2386_p3 = por %p111_p2, %p110_p1 }
   0xf   : > { %p116_p4 = scmp.ne.s32.totalorder %s2272_s19, %s2268_s18  ;;  %p42_p5 = scmp.ge.s32.totalorder %s4135_s29, 2 }
  0x10   : > { %p117_p6 = scmp.eq.s32.totalorder %s2053_s26, 0  ;;  %p184_p7 = scmp.eq.s32.totalorder %s2053_s26, 53 }
  0x11   : > { %p190_p8 = scmp.eq.s32.totalorder %s2054_s27, 53  ;;  %s4137_s29 = smov (%p42_p5, %s4135_s29), 0 }
  0x12   : > { %4114 = sst [smem:[#allocation10_spill]] %s4137_s29  ;;  %p2394_p9 = por %p117_p6, %p116_p4 }
  0x13   : > { %p2398_p10 = por %p184_p7, %p110_p1  ;;  %s98_s9 = ssub.s32 %s2292_s24, %s4137_s29 }
  0x14   : > { %p2404_p11 = por %p190_p8, %p116_p4  ;;  %p101_p12 = scmp.eq.s32.totalorder %s98_s9, 0 }
  0x15   : > { %s4116_s8 = scalar_select %p2398_p10, 1, 0 }
  0x16   : > { %s4117_s10 = scalar_select %p2404_p11, 1, 0 }
  0x17   : > { %p2096_p13 = scmp.lt.s32.totalorder %s2296_s25, 54  ;;  %s236_s11 = sand.u32 1, %s2276_s20  }
  0x18   : > { %s2411_s12 = scalar_select %p101_p12, %s2276_s20, %s103_s30  }
  0x19   : > { %s2080_s13 = smul.u32 216, %s236_s11  ;;  %p2416_p0 = pnand %p2096_p13, %p2386_p3 }
  0x1a   : > { %s2081_s14 = smul.u32 3456, %s2292_s24  ;;  %s4119_s2 = sld [smem:[#allocation11_spill]] }
  0x1b   : > { %s240_s27 = scalar_lea.vmem [#allocation3], %s2080_s13  ;;  %s2428_s6 = scalar_lea.sflag [#allocation4], %s236_s11 }
  0x1c   : > { %s249_s30 = sshll.u32 %s240_s27, 4  ;;  %p2170_p3 = pneg %p2416_p0  ;;  %s2425_s30 = int_to_ptr.vmem [resolvable:$true] %s249_s30 }
  0x20   : > { %s2423_s26 = scalar_lea.hbm %s4119_s2, %s2081_s14  ;;  %s2173_s17 = scalar_lea.hbm %s4119_s2, 6912 }
  0x21   : > { %s2168_s9 = scalar_lea.hbm %s2423_s26, 3456  ;;  %p2174_p6 = scmp.lt.u32.totalorder %s2423_s26, %s4119_s2 }
  0x22   : > { %p2169_p2 = scmp.ne.s32.totalorder %s2423_s26, %s2168_s9  ;;  %p2175_p7 = scmp.lt.u32.totalorder %s2173_s17, %s2168_s9 }
  0x23   : > { %p2177_p12 = scmp.lt.u32.totalorder %s2168_s9, %s2423_s26 }
  0x24   : > { %p2171_p4 = pnand %p2170_p3, %p2169_p2  ;;  %p2176_p8 = por %p2175_p7, %p2174_p6 }
  0x26   : > { %p2172_p5 = pneg %p2171_p4  ;;  %p2178_p13 = por %p2177_p12, %p2176_p8 }
  0x28   : > { %p2179_p1 = pnand %p2178_p13, %p2172_p5 }
  0x2a   : > { %2182 = shalt.err (!%p2179_p1)
}
  0x2b   : > { %s2183_s11 = scalar_lea.vmem %s2425_s30, 3456  ;;  %s2298_s27 = smov [#allocation3]  }
  0x2c   : > { %p2184_p2 = scmp.ne.s32.totalorder %s2425_s30, %s2183_s11  ;;  %s2188_s14 = sshll.u32 %s2298_s27, 4  ;;  %s2189_s14 = int_to_ptr.vmem [resolvable:$false] %s2188_s14 }
  0x2d   : > { %s2190_s29 = scalar_lea.vmem %s2189_s14, 6912  ;;  %p2191_p10 = scmp.lt.s32.totalorder %s2425_s30, %s2189_s14 }
  0x2e   : > { %p2186_p4 = pnand %p2184_p2, %p2170_p3  ;;  %p2192_p6 = scmp.lt.s32.totalorder %s2190_s29, %s2183_s11 }
  0x30   : > { %p2187_p11 = pneg %p2186_p4  ;;  %p2193_p7 = por %p2192_p6, %p2191_p10 }
  0x32   : > { %p2194_p8 = pnand %p2193_p7, %p2187_p11 }
  0x34   : > { %2197 = shalt.err (!%p2194_p8)
}
  0x35   : > { %s2299_s9 = smov 128   ;;  %s2300_s16 = smov 8  }
  0x36   : > { %2091 = dma.hbm_to_vmem [thread:$0]  (!%p2416_p0), %s2423_s26, 3456, %s2425_s30, %s2428_s6, %s2299_s9, %s2299_s9, %s2300_s16  }
  0x37   : > { %p257_p1 = scmp.lt.s32.totalorder %s2296_s25, 55  ;;  %p4120_p3 = scmp.ge.s32.totalorder %s2296_s25, 1 }
  0x39   : > { %p258_p5 = pnand %p4120_p3, %p257_p1 }
  0x3a   : > { %s2460_s17 = sand.u32 (!%p258_p5), 1, %s2272_s19  }
  0x3b   : > { %261 = sbr.rel (%p258_p5) target bundleno = 900 (0x384), region = 40  ;;  %s264_s11 = scalar_lea.sflag (!%p258_p5), [#allocation4], %s2460_s17 }
  0x3c   : > { %s2082_s13 = smul.u32 (!%p258_p5), 216, %s2460_s17 }
  0x3e   : > { %s267_s27 = scalar_lea.vmem (!%p258_p5), [#allocation3], %s2082_s13 }
  0x42   : > { %2259 = dma.done.wait (%p2394_p9), %s264_s11, 3456  }
  0x43   : > { %2261 = vsyncadd (%p2394_p9), %s264_s11, 4294963840  ;;  %s2059_s15 = sshll.u32 %s2460_s17, 4  ;;  %p307_p10 = scmp.lt.s32.totalorder %s2284_s22, 1 }
  0x44   : > { %s2479_s28 = scalar_lea.vmem [#allocation6], %s2059_s15  ;;  %p2062_p9 = scmp.ne.s32.totalorder %s2280_s21, 0 }
  0x45   : > { %s308_s26 = scalar_select %p307_p10, %s2284_s22, 1 }
  0x46   : > { %327 = sbr.rel (%p2062_p9) target bundleno = 77 (0x4d), region = 48  ;;  %v2301_v0 = vmov (!%p2062_p9), 0.0  }
  0x47   : > { %s2077_s30 = sshll.u32 %s308_s26, 2  ;;  %s2083_s6 = smul.u32 54, %s308_s26  ;;  %328 = vst [vmem:[#allocation2] sm:$0xff] (!%p2062_p9), %v2301_v0  ;;  %329 = vst [vmem:[#allocation2 + $0x8] sm:$0xff] (!%p2062_p9), %v2301_v0 }
  0x48   : > { %s2474_s9 = scalar_lea.vmem %s4103_s0, %s2077_s30 }
  0x49   : > { %s319_s2 = scalar_lea.vmem %s4104_s1, %s2083_s6 }
  0x4d PF: > { %v330_v1 = vlaneseq  ;;  %s2063_s7 = sshll.u32 %s2280_s21, 1  ;;  %s2078_s11 = sshll.u32 %s2280_s21, 3 }
  0x4e   : > { %s359_s26 = scalar_lea.vmem %s319_s2, %s2063_s7  ;;  %s362_s30 = scalar_lea.vmem %s267_s27, %s2078_s11 [#allocation3] }
  0x4f   : > { %v2484_v2 = vshrl.u32 %v330_v1, 7  ;;  %v2486_v3 = vld [vmem:[%s359_s26] sm:$0x3]  ;;  %s2068_s2 = sshll.u32 %s2280_s21, 2  ;;  %p2071_p11 = scmp.ne.s32.totalorder %s2280_s21, 26 }
  0x50   : > { %v2488_v4 = vld [vmem:[%s362_s30] sm:$0xff]  ;;  %v2494_v6 = vadd.s32 1, %v2486_v3  ;;  %v2497_v7 = vadd.s32 6, %v2486_v3  ;;  %v2500_v8 = vadd.s32 7, %v2486_v3  ;;  %v2514_v14 = vadd.s32 36, %v2486_v3  ;;  %s1837_s6 = scalar_lea.vmem %s4106_s3, %s2068_s2 }
  0x51   : > { %v2491_v5 = vunpack.c.h.bf16 %v2488_v4  ;;  %v2503_v9 = vadd.s32 8, %v2484_v2  ;;  %v2506_v10 = vsub.s32 0, %v2484_v2  ;;  %v2509_v11 = vsub.s32 1, %v2484_v2 }
  0x52   : > { %v734_v12 = vsub.s32 2, %v2484_v2  ;;  %v913_v13 = vsub.s32 3, %v2484_v2  ;;  %v1092_v15 = vsub.s32 4, %v2484_v2  ;;  %v2518_v16 = vadd.s32 37, %v2486_v3 }
  0x53   : > { %v2522_v17 = vrot.slane %v2486_v3, %v2509_v11  ;;  %v2526_v18 = vrot.slane %v2491_v5, %v2506_v10  ;;  %v2530_v19 = vrot.slane %v2494_v6, %v2509_v11  ;;  %v2534_v20 = vrot.slane %v2491_v5, %v2509_v11 }
  0x54   : > { %v2538_v21 = vrot.slane %v2497_v7, %v2509_v11  ;;  %v2543_v22 = vrot.slane %v2491_v5, %v734_v12  ;;  %v2547_v23 = vrot.slane %v2500_v8, %v2509_v11  ;;  %v2552_v24 = vrot.slane %v2491_v5, %v913_v13 }
  0x55   : > { %vm375_vm0 = vcmp.eq.s32.totalorder %v2484_v2, %v2522_v17  ;;  %vm377_vm1 = vcmp.eq.s32.totalorder %v2503_v9, %v2522_v17  ;;  %vm500_vm2 = vcmp.eq.s32.totalorder %v2484_v2, %v2530_v19  ;;  %vm502_vm3 = vcmp.eq.s32.totalorder %v2503_v9, %v2530_v19 }
  0x56   : > { %v437_v25 = vsel %vm375_vm0, %v2526_v18, 0.0  ;;  %v439_v26 = vsel %vm377_vm1, %v2526_v18, 0.0  ;;  %v562_v27 = vsel %vm500_vm2, %v2534_v20, 0.0  ;;  %v564_v28 = vsel %vm502_vm3, %v2534_v20, 0.0 }
  0x57   : > { %v616_v29 = vadd.f32 %v562_v27, %v437_v25  ;;  %v618_v30 = vadd.f32 %v564_v28, %v439_v26  ;;  %vm679_vm4 = vcmp.eq.s32.totalorder %v2484_v2, %v2538_v21  ;;  %vm681_vm5 = vcmp.eq.s32.totalorder %v2503_v9, %v2538_v21 }
  0x58   : > { %v741_v31 = vsel %vm679_vm4, %v2543_v22, 0.0  ;;  %v743_v32 = vsel %vm681_vm5, %v2543_v22, 0.0  ;;  %vm858_vm6 = vcmp.eq.s32.totalorder %v2484_v2, %v2547_v23  ;;  %vm860_vm7 = vcmp.eq.s32.totalorder %v2503_v9, %v2547_v23 }
  0x59   : > { %v795_v33 = vadd.f32 %v741_v31, %v616_v29  ;;  %v797_v34 = vadd.f32 %v743_v32, %v618_v30  ;;  %v920_v35 = vsel %vm858_vm6, %v2552_v24, 0.0  ;;  %v922_v36 = vsel %vm860_vm7, %v2552_v24, 0.0 }
  0x5a   : > { %v2580_v37 = vrot.slane %v2514_v14, %v2509_v11  ;;  %v2585_v38 = vrot.slane %v2491_v5, %v1092_v15  ;;  %v2589_v39 = vrot.slane %v2518_v16, %v2509_v11  ;;  %v1271_v40 = vsub.s32 5, %v2484_v2 }
  0x5b   : > { %v974_v41 = vadd.f32 %v920_v35, %v795_v33  ;;  %v976_v42 = vadd.f32 %v922_v36, %v797_v34  ;;  %v2593_v43 = vadd.s32 42, %v2486_v3  ;;  %v1450_v44 = vsub.s32 6, %v2484_v2 }
  0x5c   : > { %vm1037_vm8 = vcmp.eq.s32.totalorder %v2484_v2, %v2580_v37  ;;  %vm1039_vm9 = vcmp.eq.s32.totalorder %v2503_v9, %v2580_v37  ;;  %vm1216_vm10 = vcmp.eq.s32.totalorder %v2484_v2, %v2589_v39  ;;  %vm1218_vm11 = vcmp.eq.s32.totalorder %v2503_v9, %v2589_v39 }
  0x5d   : > { %v1099_v45 = vsel %vm1037_vm8, %v2585_v38, 0.0  ;;  %v1101_v46 = vsel %vm1039_vm9, %v2585_v38, 0.0  ;;  %v2609_v47 = vrot.slane %v2491_v5, %v1271_v40  ;;  %v2613_v48 = vrot.slane %v2593_v43, %v2509_v11 }
  0x5e   : > { %v1153_v49 = vadd.f32 %v1099_v45, %v974_v41  ;;  %v1155_v50 = vadd.f32 %v1101_v46, %v976_v42  ;;  %v2618_v51 = vrot.slane %v2491_v5, %v1450_v44  ;;  %v1564_v52 = vadd.s32 43, %v2486_v3 }
  0x5f   : > { %v1278_v53 = vsel %vm1216_vm10, %v2609_v47, 0.0  ;;  %v1280_v54 = vsel %vm1218_vm11, %v2609_v47, 0.0  ;;  %vm1395_vm12 = vcmp.eq.s32.totalorder %v2484_v2, %v2613_v48  ;;  %vm1397_vm13 = vcmp.eq.s32.totalorder %v2503_v9, %v2613_v48 }
  0x60   : > { %v1332_v55 = vadd.f32 %v1278_v53, %v1153_v49  ;;  %v1334_v56 = vadd.f32 %v1280_v54, %v1155_v50  ;;  %v1457_v57 = vsel %vm1395_vm12, %v2618_v51, 0.0  ;;  %v1459_v58 = vsel %vm1397_vm13, %v2618_v51, 0.0 }
  0x61   : > { %v2630_v59 = vrot.slane %v1564_v52, %v2509_v11  ;;  %v1629_v60 = vsub.s32 7, %v2484_v2  ;;  %v2634_v61 = vunpack.c.l.bf16 %v2488_v4  ;;  %v2638_v62 = vrot.slane %v2486_v3, %v2506_v10 }
  0x62   : > { %v1511_v63 = vadd.f32 %v1457_v57, %v1332_v55  ;;  %v1513_v0 = vadd.f32 %v1459_v58, %v1334_v56  ;;  %v2642_v1 = vrot.slane %v2494_v6, %v2506_v10  ;;  %v2646_v25 = vrot.slane %v2497_v7, %v2506_v10 }
  0x63   : > { %vm1574_vm14 = vcmp.eq.s32.totalorder %v2484_v2, %v2630_v59  ;;  %vm1576_vm15 = vcmp.eq.s32.totalorder %v2503_v9, %v2630_v59  ;;  %v2655_v3 = vrot.slane %v2491_v5, %v1629_v60  ;;  %vm374_vm0 = vcmp.eq.s32.totalorder %v2484_v2, %v2638_v62 }
  0x64   : > { %vm376_vm1 = vcmp.eq.s32.totalorder %v2503_v9, %v2638_v62  ;;  %v2663_v4 = vrot.slane %v2634_v61, %v2506_v10  ;;  %vm499_vm2 = vcmp.eq.s32.totalorder %v2484_v2, %v2642_v1  ;;  %vm501_vm3 = vcmp.eq.s32.totalorder %v2503_v9, %v2642_v1 }
  0x65   : > { %v1636_v6 = vsel %vm1574_vm14, %v2655_v3, 0.0  ;;  %v1638_v5 = vsel %vm1576_vm15, %v2655_v3, 0.0  ;;  %v2673_v7 = vrot.slane %v2634_v61, %v2509_v11  ;;  %vm678_vm4 = vcmp.eq.s32.totalorder %v2484_v2, %v2646_v25 }
  0x66   : > { %v1690_v26 = vadd.f32 %v1636_v6, %v1511_v63  ;;  %v1692_v27 = vadd.f32 %v1638_v5, %v1513_v0  ;;  %v436_v28 = vsel %vm374_vm0, %v2663_v4, 0.0  ;;  %v438_v29 = vsel %vm376_vm1, %v2663_v4, 0.0 }
  0x67   : > { %v561_v30 = vsel %vm499_vm2, %v2673_v7, 0.0  ;;  %v563_v31 = vsel %vm501_vm3, %v2673_v7, 0.0  ;;  %vm680_vm5 = vcmp.eq.s32.totalorder %v2503_v9, %v2646_v25  ;;  %v2686_v11 = vrot.slane %v2634_v61, %v734_v12 }
  0x68   : > { %v1745_v32 = vpack.c.bf16 %v1692_v27, %v1690_v26  ;;  %v615_v33 = vadd.f32 %v561_v30, %v436_v28  ;;  %v617_v34 = vadd.f32 %v563_v31, %v438_v29  ;;  %v2690_v35 = vrot.slane %v2500_v8, %v2506_v10 }
  0x69   : > { %v740_v36 = vsel %vm678_vm4, %v2686_v11, 0.0  ;;  %v742_v41 = vsel %vm680_vm5, %v2686_v11, 0.0  ;;  %v2697_v42 = vrot.slane %v2634_v61, %v913_v13  ;;  %v2701_v12 = vrot.slane %v2514_v14, %v2506_v10 }
  0x6a   : > { %1793 = vmatprep.subr.bf16.mxu0 %v1745_v32  ;;  %v794_v45 = vadd.f32 %v740_v36, %v615_v33  ;;  %v796_v46 = vadd.f32 %v742_v41, %v617_v34  ;;  %vm857_vm6 = vcmp.eq.s32.totalorder %v2484_v2, %v2690_v35  ;;  %vm859_vm7 = vcmp.eq.s32.totalorder %v2503_v9, %v2690_v35 }
  0x6b   : > { %v919_v8 = vsel %vm857_vm6, %v2697_v42, 0.0  ;;  %v921_v49 = vsel %vm859_vm7, %v2697_v42, 0.0  ;;  %vm1036_vm8 = vcmp.eq.s32.totalorder %v2484_v2, %v2701_v12  ;;  %vm1038_vm9 = vcmp.eq.s32.totalorder %v2503_v9, %v2701_v12 }
  0x6c   : > { %v973_v13 = vadd.f32 %v919_v8, %v794_v45  ;;  %v975_v14 = vadd.f32 %v921_v49, %v796_v46  ;;  %v2716_v50 = vrot.slane %v2634_v61, %v1092_v15  ;;  %v2720_v53 = vrot.slane %v2518_v16, %v2506_v10 }
  0x6d   : > { %v2725_v54 = vrot.slane %v2634_v61, %v1271_v40  ;;  %v2729_v55 = vrot.slane %v2593_v43, %v2506_v10  ;;  %v2734_v56 = vrot.slane %v2634_v61, %v1450_v44  ;;  %v2737_v15 = vrot.slane %v1564_v52, %v2506_v10 }
  0x6e   : > { %v1098_v16 = vsel %vm1036_vm8, %v2716_v50, 0.0  ;;  %v1100_v57 = vsel %vm1038_vm9, %v2716_v50, 0.0  ;;  %vm1215_vm10 = vcmp.eq.s32.totalorder %v2484_v2, %v2720_v53  ;;  %vm1217_vm11 = vcmp.eq.s32.totalorder %v2503_v9, %v2720_v53 }
  0x6f   : > { %v1152_v40 = vadd.f32 %v1098_v16, %v973_v13  ;;  %v1154_v43 = vadd.f32 %v1100_v57, %v975_v14  ;;  %v1277_v58 = vsel %vm1215_vm10, %v2725_v54, 0.0  ;;  %v1279_v44 = vsel %vm1217_vm11, %v2725_v54, 0.0 }
  0x70   : > { %vm1394_vm12 = vcmp.eq.s32.totalorder %v2484_v2, %v2729_v55  ;;  %vm1396_vm13 = vcmp.eq.s32.totalorder %v2503_v9, %v2729_v55  ;;  %vm1573_vm14 = vcmp.eq.s32.totalorder %v2484_v2, %v2737_v15  ;;  %vm1575_vm15 = vcmp.eq.s32.totalorder %v2503_v9, %v2737_v15 }
  0x71   : > { %v1331_v10 = vadd.f32 %v1277_v58, %v1152_v40  ;;  %v1333_v52 = vadd.f32 %v1279_v44, %v1154_v43  ;;  %v1456_v63 = vsel %vm1394_vm12, %v2734_v56, 0.0  ;;  %v1458_v0 = vsel %vm1396_vm13, %v2734_v56, 0.0 }
  0x72   : > { %v2760_v6 = vrot.slane %v2634_v61, %v1629_v60  ;;  %v2763_v5 = vadd.s32 16, %v2484_v2  ;;  %v2766_v26 = vadd.s32 24, %v2484_v2  ;;  %v2769_v27 = vadd.s32 32, %v2484_v2 }
  0x73   : > { %v1510_v9 = vadd.f32 %v1456_v63, %v1331_v10  ;;  %v1512_v28 = vadd.f32 %v1458_v0, %v1333_v52  ;;  %v2772_v29 = vadd.s32 40, %v2484_v2  ;;  %v2775_v30 = vadd.s32 48, %v2484_v2 }
  0x74   : > { %v1635_v60 = vsel %vm1573_vm14, %v2760_v6, 0.0  ;;  %v1637_v61 = vsel %vm1575_vm15, %v2760_v6, 0.0  ;;  %vm379_vm0 = vcmp.eq.s32.totalorder %v2763_v5, %v2522_v17  ;;  %vm381_vm1 = vcmp.eq.s32.totalorder %v2766_v26, %v2522_v17 }
  0x75   : > { %v1689_v31 = vadd.f32 %v1635_v60, %v1510_v9  ;;  %v1691_v32 = vadd.f32 %v1637_v61, %v1512_v28  ;;  %v441_v33 = vsel %vm379_vm0, %v2526_v18, 0.0  ;;  %v443_v34 = vsel %vm381_vm1, %v2526_v18, 0.0 }
  0x76   : > { %vm504_vm2 = vcmp.eq.s32.totalorder %v2763_v5, %v2530_v19  ;;  %vm506_vm3 = vcmp.eq.s32.totalorder %v2766_v26, %v2530_v19  ;;  %vm683_vm4 = vcmp.eq.s32.totalorder %v2763_v5, %v2538_v21  ;;  %vm685_vm5 = vcmp.eq.s32.totalorder %v2766_v26, %v2538_v21 }
  0x77   : > { %v1744_v36 = vpack.c.bf16 %v1691_v32, %v1689_v31  ;;  %v566_v41 = vsel %vm504_vm2, %v2534_v20, 0.0  ;;  %v568_v45 = vsel %vm506_vm3, %v2534_v20, 0.0  ;;  %v745_v46 = vsel %vm683_vm4, %v2543_v22, 0.0 }
  0x78   : > { %v620_v8 = vadd.f32 %v566_v41, %v441_v33  ;;  %v622_v49 = vadd.f32 %v568_v45, %v443_v34  ;;  %v747_v13 = vsel %vm685_vm5, %v2543_v22, 0.0  ;;  %vm862_vm6 = vcmp.eq.s32.totalorder %v2763_v5, %v2547_v23 }
  0x79   : > { %1794 = vmatpush1.bf16.msra.mxu0 %v1744_v36  ;;  %vm864_vm7 = vcmp.eq.s32.totalorder %v2766_v26, %v2547_v23  ;;  %v924_v14 = vsel %vm862_vm6, %v2552_v24, 0.0  ;;  %vm1041_vm8 = vcmp.eq.s32.totalorder %v2763_v5, %v2580_v37  ;;  %vm1043_vm9 = vcmp.eq.s32.totalorder %v2766_v26, %v2580_v37 }
  0x7a   : > { %v799_v16 = vadd.f32 %v745_v46, %v620_v8  ;;  %v801_v57 = vadd.f32 %v747_v13, %v622_v49  ;;  %v926_v40 = vsel %vm864_vm7, %v2552_v24, 0.0  ;;  %v1103_v43 = vsel %vm1041_vm8, %v2585_v38, 0.0 }
  0x7b   : > { %v1105_v58 = vsel %vm1043_vm9, %v2585_v38, 0.0  ;;  %vm1220_vm10 = vcmp.eq.s32.totalorder %v2763_v5, %v2589_v39  ;;  %vm1222_vm11 = vcmp.eq.s32.totalorder %v2766_v26, %v2589_v39  ;;  %vm1399_vm12 = vcmp.eq.s32.totalorder %v2763_v5, %v2613_v48 }
  0x7c   : > { %v978_v44 = vadd.f32 %v924_v14, %v799_v16  ;;  %v980_v10 = vadd.f32 %v926_v40, %v801_v57  ;;  %v1282_v52 = vsel %vm1220_vm10, %v2609_v47, 0.0  ;;  %v1284_v63 = vsel %vm1222_vm11, %v2609_v47, 0.0 }
  0x7d   : > { %vm1401_vm13 = vcmp.eq.s32.totalorder %v2766_v26, %v2613_v48  ;;  %v1461_v0 = vsel %vm1399_vm12, %v2618_v51, 0.0  ;;  %vm1578_vm14 = vcmp.eq.s32.totalorder %v2763_v5, %v2630_v59  ;;  %vm1580_vm15 = vcmp.eq.s32.totalorder %v2766_v26, %v2630_v59 }
  0x7e   : > { %v1157_v9 = vadd.f32 %v1103_v43, %v978_v44  ;;  %v1159_v28 = vadd.f32 %v1105_v58, %v980_v10  ;;  %v1463_v60 = vsel %vm1401_vm13, %v2618_v51, 0.0  ;;  %v1640_v61 = vsel %vm1578_vm14, %v2655_v3, 0.0 }
  0x7f   : > { %v1642_v31 = vsel %vm1580_vm15, %v2655_v3, 0.0  ;;  %vm378_vm0 = vcmp.eq.s32.totalorder %v2763_v5, %v2638_v62  ;;  %vm380_vm1 = vcmp.eq.s32.totalorder %v2766_v26, %v2638_v62  ;;  %vm503_vm2 = vcmp.eq.s32.totalorder %v2763_v5, %v2642_v1 }
  0x80   : > { %v1336_v32 = vadd.f32 %v1282_v52, %v1157_v9  ;;  %v1338_v33 = vadd.f32 %v1284_v63, %v1159_v28  ;;  %v440_v34 = vsel %vm378_vm0, %v2663_v4, 0.0  ;;  %v442_v36 = vsel %vm380_vm1, %v2663_v4, 0.0 }
  0x81   : > { %vm505_vm3 = vcmp.eq.s32.totalorder %v2766_v26, %v2642_v1  ;;  %v565_v41 = vsel %vm503_vm2, %v2673_v7, 0.0  ;;  %vm682_vm4 = vcmp.eq.s32.totalorder %v2763_v5, %v2646_v25  ;;  %vm684_vm5 = vcmp.eq.s32.totalorder %v2766_v26, %v2646_v25 }
  0x82   : > { %v1515_v45 = vadd.f32 %v1461_v0, %v1336_v32  ;;  %v1517_v46 = vadd.f32 %v1463_v60, %v1338_v33  ;;  %v567_v8 = vsel %vm505_vm3, %v2673_v7, 0.0  ;;  %v619_v49 = vadd.f32 %v565_v41, %v440_v34 }
  0x83   : > { %v621_v13 = vadd.f32 %v567_v8, %v442_v36  ;;  %v744_v14 = vsel %vm682_vm4, %v2686_v11, 0.0  ;;  %v746_v16 = vsel %vm684_vm5, %v2686_v11, 0.0  ;;  %vm861_vm6 = vcmp.eq.s32.totalorder %v2763_v5, %v2690_v35 }
  0x84   : > { %v1694_v57 = vadd.f32 %v1640_v61, %v1515_v45  ;;  %v1696_v40 = vadd.f32 %v1642_v31, %v1517_v46  ;;  %v798_v43 = vadd.f32 %v744_v14, %v619_v49  ;;  %vm863_vm7 = vcmp.eq.s32.totalorder %v2766_v26, %v2690_v35 }
  0x85   : > { %v800_v58 = vadd.f32 %v746_v16, %v621_v13  ;;  %v923_v44 = vsel %vm861_vm6, %v2697_v42, 0.0  ;;  %v925_v10 = vsel %vm863_vm7, %v2697_v42, 0.0  ;;  %vm1040_vm8 = vcmp.eq.s32.totalorder %v2763_v5, %v2701_v12 }
  0x86   : > { %v1747_v52 = vpack.c.bf16 %v1696_v40, %v1694_v57  ;;  %v977_v63 = vadd.f32 %v923_v44, %v798_v43  ;;  %vm1042_vm9 = vcmp.eq.s32.totalorder %v2766_v26, %v2701_v12  ;;  %v1102_v0 = vsel %vm1040_vm8, %v2716_v50, 0.0 }
  0x87   : > { %v979_v9 = vadd.f32 %v925_v10, %v800_v58  ;;  %v1104_v28 = vsel %vm1042_vm9, %v2716_v50, 0.0  ;;  %vm1219_vm10 = vcmp.eq.s32.totalorder %v2763_v5, %v2720_v53  ;;  %vm1221_vm11 = vcmp.eq.s32.totalorder %v2766_v26, %v2720_v53 }
  0x88   : > { %1795 = vmatprep.subr.bf16.mxu0 %v1747_v52  ;;  %v1156_v60 = vadd.f32 %v1102_v0, %v977_v63  ;;  %v1281_v61 = vsel %vm1219_vm10, %v2725_v54, 0.0  ;;  %v1283_v31 = vsel %vm1221_vm11, %v2725_v54, 0.0  ;;  %vm1398_vm12 = vcmp.eq.s32.totalorder %v2763_v5, %v2729_v55 }
  0x89   : > { %v1158_v32 = vadd.f32 %v1104_v28, %v979_v9  ;;  %vm1400_vm13 = vcmp.eq.s32.totalorder %v2766_v26, %v2729_v55  ;;  %v1460_v33 = vsel %vm1398_vm12, %v2734_v56, 0.0  ;;  %vm1577_vm14 = vcmp.eq.s32.totalorder %v2763_v5, %v2737_v15 }
  0x8a   : > { %v1335_v34 = vadd.f32 %v1281_v61, %v1156_v60  ;;  %v1462_v36 = vsel %vm1400_vm13, %v2734_v56, 0.0  ;;  %vm1579_vm15 = vcmp.eq.s32.totalorder %v2766_v26, %v2737_v15  ;;  %v1639_v41 = vsel %vm1577_vm14, %v2760_v6, 0.0 }
  0x8b   : > { %v1337_v45 = vadd.f32 %v1283_v31, %v1158_v32  ;;  %v1641_v46 = vsel %vm1579_vm15, %v2760_v6, 0.0  ;;  %vm383_vm0 = vcmp.eq.s32.totalorder %v2769_v27, %v2522_v17  ;;  %vm385_vm1 = vcmp.eq.s32.totalorder %v2772_v29, %v2522_v17 }
  0x8c   : > { %v1514_v8 = vadd.f32 %v1460_v33, %v1335_v34  ;;  %v445_v5 = vsel %vm383_vm0, %v2526_v18, 0.0  ;;  %v447_v49 = vsel %vm385_vm1, %v2526_v18, 0.0  ;;  %vm508_vm2 = vcmp.eq.s32.totalorder %v2769_v27, %v2530_v19 }
  0x8d   : > { %v1516_v26 = vadd.f32 %v1462_v36, %v1337_v45  ;;  %vm510_vm3 = vcmp.eq.s32.totalorder %v2772_v29, %v2530_v19  ;;  %v570_v13 = vsel %vm508_vm2, %v2534_v20, 0.0  ;;  %vm687_vm4 = vcmp.eq.s32.totalorder %v2769_v27, %v2538_v21 }
  0x8e   : > { %v1693_v14 = vadd.f32 %v1639_v41, %v1514_v8  ;;  %v572_v16 = vsel %vm510_vm3, %v2534_v20, 0.0  ;;  %v624_v57 = vadd.f32 %v570_v13, %v445_v5  ;;  %vm689_vm5 = vcmp.eq.s32.totalorder %v2772_v29, %v2538_v21 }
  0x8f   : > { %v1695_v40 = vadd.f32 %v1641_v46, %v1516_v26  ;;  %v626_v43 = vadd.f32 %v572_v16, %v447_v49  ;;  %v749_v58 = vsel %vm687_vm4, %v2543_v22, 0.0  ;;  %v751_v44 = vsel %vm689_vm5, %v2543_v22, 0.0 }
  0x90   : > { %v803_v10 = vadd.f32 %v749_v58, %v624_v57  ;;  %vm866_vm6 = vcmp.eq.s32.totalorder %v2769_v27, %v2547_v23  ;;  %vm868_vm7 = vcmp.eq.s32.totalorder %v2772_v29, %v2547_v23  ;;  %vm1045_vm8 = vcmp.eq.s32.totalorder %v2769_v27, %v2580_v37 }
  0x91   : > { %v1746_v52 = vpack.c.bf16 %v1695_v40, %v1693_v14  ;;  %v805_v63 = vadd.f32 %v751_v44, %v626_v43  ;;  %v928_v0 = vsel %vm866_vm6, %v2552_v24, 0.0  ;;  %v930_v9 = vsel %vm868_vm7, %v2552_v24, 0.0 }
  0x92   : > { %v982_v28 = vadd.f32 %v928_v0, %v803_v10  ;;  %vm1047_vm9 = vcmp.eq.s32.totalorder %v2772_v29, %v2580_v37  ;;  %v1107_v60 = vsel %vm1045_vm8, %v2585_v38, 0.0  ;;  %vm1224_vm10 = vcmp.eq.s32.totalorder %v2769_v27, %v2589_v39 }
  0x93   : > { %1796 = vmatpush1.bf16.msra.mxu0 %v1746_v52  ;;  %v984_v61 = vadd.f32 %v930_v9, %v805_v63  ;;  %v1109_v31 = vsel %vm1047_vm9, %v2585_v38, 0.0  ;;  %vm1226_vm11 = vcmp.eq.s32.totalorder %v2772_v29, %v2589_v39  ;;  %v1286_v32 = vsel %vm1224_vm10, %v2609_v47, 0.0 }
  0x94   : > { %v1161_v33 = vadd.f32 %v1107_v60, %v982_v28  ;;  %v1288_v34 = vsel %vm1226_vm11, %v2609_v47, 0.0  ;;  %vm1403_vm12 = vcmp.eq.s32.totalorder %v2769_v27, %v2613_v48  ;;  %vm1405_vm13 = vcmp.eq.s32.totalorder %v2772_v29, %v2613_v48 }
  0x95   : > { %v1163_v36 = vadd.f32 %v1109_v31, %v984_v61  ;;  %v1465_v41 = vsel %vm1403_vm12, %v2618_v51, 0.0  ;;  %v1467_v45 = vsel %vm1405_vm13, %v2618_v51, 0.0  ;;  %vm1582_vm14 = vcmp.eq.s32.totalorder %v2769_v27, %v2630_v59 }
  0x96   : > { %v1340_v46 = vadd.f32 %v1286_v32, %v1161_v33  ;;  %vm1584_vm15 = vcmp.eq.s32.totalorder %v2772_v29, %v2630_v59  ;;  %v1644_v8 = vsel %vm1582_vm14, %v2655_v3, 0.0  ;;  %vm382_vm0 = vcmp.eq.s32.totalorder %v2769_v27, %v2638_v62 }
  0x97   : > { %v1342_v5 = vadd.f32 %v1288_v34, %v1163_v36  ;;  %v1646_v49 = vsel %vm1584_vm15, %v2655_v3, 0.0  ;;  %vm384_vm1 = vcmp.eq.s32.totalorder %v2772_v29, %v2638_v62  ;;  %v444_v26 = vsel %vm382_vm0, %v2663_v4, 0.0 }
  0x98   : > { %v1519_v13 = vadd.f32 %v1465_v41, %v1340_v46  ;;  %v446_v14 = vsel %vm384_vm1, %v2663_v4, 0.0  ;;  %vm507_vm2 = vcmp.eq.s32.totalorder %v2769_v27, %v2642_v1  ;;  %vm509_vm3 = vcmp.eq.s32.totalorder %v2772_v29, %v2642_v1 }
  0x99   : > { %v1521_v16 = vadd.f32 %v1467_v45, %v1342_v5  ;;  %v569_v57 = vsel %vm507_vm2, %v2673_v7, 0.0  ;;  %v571_v40 = vsel %vm509_vm3, %v2673_v7, 0.0  ;;  %vm686_vm4 = vcmp.eq.s32.totalorder %v2769_v27, %v2646_v25 }
  0x9a   : > { %v1698_v43 = vadd.f32 %v1644_v8, %v1519_v13  ;;  %v623_v58 = vadd.f32 %v569_v57, %v444_v26  ;;  %v625_v44 = vadd.f32 %v571_v40, %v446_v14  ;;  %vm688_vm5 = vcmp.eq.s32.totalorder %v2772_v29, %v2646_v25 }
  0x9b   : > { %v1700_v10 = vadd.f32 %v1646_v49, %v1521_v16  ;;  %v748_v52 = vsel %vm686_vm4, %v2686_v11, 0.0  ;;  %v750_v63 = vsel %vm688_vm5, %v2686_v11, 0.0  ;;  %vm865_vm6 = vcmp.eq.s32.totalorder %v2769_v27, %v2690_v35 }
  0x9c   : > { %v802_v0 = vadd.f32 %v748_v52, %v623_v58  ;;  %v804_v9 = vadd.f32 %v750_v63, %v625_v44  ;;  %vm867_vm7 = vcmp.eq.s32.totalorder %v2772_v29, %v2690_v35  ;;  %v927_v28 = vsel %vm865_vm6, %v2697_v42, 0.0 }
  0x9d   : > { %v1749_v60 = vpack.c.bf16 %v1700_v10, %v1698_v43  ;;  %v929_v61 = vsel %vm867_vm7, %v2697_v42, 0.0  ;;  %vm1044_vm8 = vcmp.eq.s32.totalorder %v2769_v27, %v2701_v12  ;;  %vm1046_vm9 = vcmp.eq.s32.totalorder %v2772_v29, %v2701_v12 }
  0x9e   : > { %v981_v31 = vadd.f32 %v927_v28, %v802_v0  ;;  %v983_v32 = vadd.f32 %v929_v61, %v804_v9  ;;  %v1106_v33 = vsel %vm1044_vm8, %v2716_v50, 0.0  ;;  %v1108_v34 = vsel %vm1046_vm9, %v2716_v50, 0.0 }
  0x9f   : > { %1797 = vmatprep.subr.bf16.mxu0 %v1749_v60  ;;  %vm1223_vm10 = vcmp.eq.s32.totalorder %v2769_v27, %v2720_v53  ;;  %vm1225_vm11 = vcmp.eq.s32.totalorder %v2772_v29, %v2720_v53  ;;  %vm1402_vm12 = vcmp.eq.s32.totalorder %v2769_v27, %v2729_v55  ;;  %vm1404_vm13 = vcmp.eq.s32.totalorder %v2772_v29, %v2729_v55 }
  0xa0   : > { %v1160_v36 = vadd.f32 %v1106_v33, %v981_v31  ;;  %v1162_v41 = vadd.f32 %v1108_v34, %v983_v32  ;;  %v1285_v45 = vsel %vm1223_vm10, %v2725_v54, 0.0  ;;  %v1287_v46 = vsel %vm1225_vm11, %v2725_v54, 0.0 }
  0xa1   : > { %v1464_v8 = vsel %vm1402_vm12, %v2734_v56, 0.0  ;;  %v1466_v5 = vsel %vm1404_vm13, %v2734_v56, 0.0  ;;  %vm1581_vm14 = vcmp.eq.s32.totalorder %v2769_v27, %v2737_v15  ;;  %vm1583_vm15 = vcmp.eq.s32.totalorder %v2772_v29, %v2737_v15 }
  0xa2   : > { %v1339_v49 = vadd.f32 %v1285_v45, %v1160_v36  ;;  %v1341_v26 = vadd.f32 %v1287_v46, %v1162_v41  ;;  %v1643_v13 = vsel %vm1581_vm14, %v2760_v6, 0.0  ;;  %v1645_v14 = vsel %vm1583_vm15, %v2760_v6, 0.0 }
  0xa3   : > { %v2972_v16 = vadd.s32 56, %v2484_v2  ;;  %vm387_vm0 = vcmp.eq.s32.totalorder %v2775_v30, %v2522_v17  ;;  %vm512_vm1 = vcmp.eq.s32.totalorder %v2775_v30, %v2530_v19  ;;  %vm691_vm2 = vcmp.eq.s32.totalorder %v2775_v30, %v2538_v21 }
  0xa4   : > { %v1518_v27 = vadd.f32 %v1464_v8, %v1339_v49  ;;  %v1520_v29 = vadd.f32 %v1466_v5, %v1341_v26  ;;  %v449_v57 = vsel %vm387_vm0, %v2526_v18, 0.0  ;;  %v574_v40 = vsel %vm512_vm1, %v2534_v20, 0.0 }
  0xa5   : > { %vm389_vm3 = vcmp.eq.s32.totalorder %v2972_v16, %v2522_v17  ;;  %vm514_vm4 = vcmp.eq.s32.totalorder %v2972_v16, %v2530_v19  ;;  %v628_v43 = vadd.f32 %v574_v40, %v449_v57  ;;  %vm693_vm5 = vcmp.eq.s32.totalorder %v2972_v16, %v2538_v21 }
  0xa6   : > { %v1697_v58 = vadd.f32 %v1643_v13, %v1518_v27  ;;  %v1699_v44 = vadd.f32 %v1645_v14, %v1520_v29  ;;  %v451_v10 = vsel %vm389_vm3, %v2526_v18, 0.0  ;;  %v576_v52 = vsel %vm514_vm4, %v2534_v20, 0.0 }
  0xa7   : > { %v630_v63 = vadd.f32 %v576_v52, %v451_v10  ;;  %v753_v0 = vsel %vm691_vm2, %v2543_v22, 0.0  ;;  %v755_v9 = vsel %vm693_vm5, %v2543_v22, 0.0  ;;  %vm870_vm6 = vcmp.eq.s32.totalorder %v2775_v30, %v2547_v23 }
  0xa8   : > { %v1748_v28 = vpack.c.bf16 %v1699_v44, %v1697_v58  ;;  %v807_v60 = vadd.f32 %v753_v0, %v628_v43  ;;  %vm872_vm7 = vcmp.eq.s32.totalorder %v2972_v16, %v2547_v23  ;;  %v932_v61 = vsel %vm870_vm6, %v2552_v24, 0.0 }
  0xa9   : > { %v809_v31 = vadd.f32 %v755_v9, %v630_v63  ;;  %v934_v32 = vsel %vm872_vm7, %v2552_v24, 0.0  ;;  %vm1049_vm8 = vcmp.eq.s32.totalorder %v2775_v30, %v2580_v37  ;;  %vm1051_vm9 = vcmp.eq.s32.totalorder %v2972_v16, %v2580_v37 }
  0xaa   : > { %1798 = vmatpush1.bf16.msra.mxu0 %v1748_v28  ;;  %v986_v33 = vadd.f32 %v932_v61, %v807_v60  ;;  %v1111_v34 = vsel %vm1049_vm8, %v2585_v38, 0.0  ;;  %v1113_v36 = vsel %vm1051_vm9, %v2585_v38, 0.0  ;;  %vm1228_vm10 = vcmp.eq.s32.totalorder %v2775_v30, %v2589_v39 }
  0xab   : > { %v988_v41 = vadd.f32 %v934_v32, %v809_v31  ;;  %vm1230_vm11 = vcmp.eq.s32.totalorder %v2972_v16, %v2589_v39  ;;  %v1290_v45 = vsel %vm1228_vm10, %v2609_v47, 0.0  ;;  %vm1407_vm12 = vcmp.eq.s32.totalorder %v2775_v30, %v2613_v48 }
  0xac   : > { %v1165_v46 = vadd.f32 %v1111_v34, %v986_v33  ;;  %v1292_v8 = vsel %vm1230_vm11, %v2609_v47, 0.0  ;;  %vm1409_vm13 = vcmp.eq.s32.totalorder %v2972_v16, %v2613_v48  ;;  %v1469_v5 = vsel %vm1407_vm12, %v2618_v51, 0.0 }
  0xad   : > { %v1167_v49 = vadd.f32 %v1113_v36, %v988_v41  ;;  %v1471_v26 = vsel %vm1409_vm13, %v2618_v51, 0.0  ;;  %vm1586_vm14 = vcmp.eq.s32.totalorder %v2775_v30, %v2630_v59  ;;  %vm1588_vm15 = vcmp.eq.s32.totalorder %v2972_v16, %v2630_v59 }
  0xae   : > { %v1344_v13 = vadd.f32 %v1290_v45, %v1165_v46  ;;  %v1648_v14 = vsel %vm1586_vm14, %v2655_v3, 0.0  ;;  %v1650_v27 = vsel %vm1588_vm15, %v2655_v3, 0.0  ;;  %vm386_vm0 = vcmp.eq.s32.totalorder %v2775_v30, %v2638_v62 }
  0xaf   : > { %v1346_v29 = vadd.f32 %v1292_v8, %v1167_v49  ;;  %vm388_vm1 = vcmp.eq.s32.totalorder %v2972_v16, %v2638_v62  ;;  %v448_v57 = vsel %vm386_vm0, %v2663_v4, 0.0  ;;  %vm511_vm2 = vcmp.eq.s32.totalorder %v2775_v30, %v2642_v1 }
  0xb0   : > { %v1523_v40 = vadd.f32 %v1469_v5, %v1344_v13  ;;  %v450_v43 = vsel %vm388_vm1, %v2663_v4, 0.0  ;;  %vm513_vm3 = vcmp.eq.s32.totalorder %v2972_v16, %v2642_v1  ;;  %v573_v58 = vsel %vm511_vm2, %v2673_v7, 0.0 }
  0xb1   : > { %v1525_v44 = vadd.f32 %v1471_v26, %v1346_v29  ;;  %v575_v10 = vsel %vm513_vm3, %v2673_v7, 0.0  ;;  %v627_v52 = vadd.f32 %v573_v58, %v448_v57  ;;  %vm690_vm4 = vcmp.eq.s32.totalorder %v2775_v30, %v2646_v25 }
  0xb2   : > { %v1702_v63 = vadd.f32 %v1648_v14, %v1523_v40  ;;  %v629_v0 = vadd.f32 %v575_v10, %v450_v43  ;;  %vm692_vm5 = vcmp.eq.s32.totalorder %v2972_v16, %v2646_v25  ;;  %v752_v9 = vsel %vm690_vm4, %v2686_v11, 0.0 }
  0xb3   : > { %v1704_v28 = vadd.f32 %v1650_v27, %v1525_v44  ;;  %v754_v60 = vsel %vm692_vm5, %v2686_v11, 0.0  ;;  %v806_v61 = vadd.f32 %v752_v9, %v627_v52  ;;  %vm869_vm6 = vcmp.eq.s32.totalorder %v2775_v30, %v2690_v35 }
  0xb4   : > { %v808_v31 = vadd.f32 %v754_v60, %v629_v0  ;;  %vm871_vm7 = vcmp.eq.s32.totalorder %v2972_v16, %v2690_v35  ;;  %v931_v32 = vsel %vm869_vm6, %v2697_v42, 0.0  ;;  %vm1048_vm8 = vcmp.eq.s32.totalorder %v2775_v30, %v2701_v12 }
  0xb5   : > { %v1751_v33 = vpack.c.bf16 %v1704_v28, %v1702_v63  ;;  %v933_v34 = vsel %vm871_vm7, %v2697_v42, 0.0  ;;  %v985_v36 = vadd.f32 %v931_v32, %v806_v61  ;;  %vm1050_vm9 = vcmp.eq.s32.totalorder %v2972_v16, %v2701_v12 }
  0xb6   : > { %v987_v41 = vadd.f32 %v933_v34, %v808_v31  ;;  %v1110_v45 = vsel %vm1048_vm8, %v2716_v50, 0.0  ;;  %v1112_v46 = vsel %vm1050_vm9, %v2716_v50, 0.0  ;;  %vm1227_vm10 = vcmp.eq.s32.totalorder %v2775_v30, %v2720_v53 }
  0xb7   : > { %1799 = vmatprep.subr.bf16.mxu0 %v1751_v33  ;;  %v1164_v8 = vadd.f32 %v1110_v45, %v985_v36  ;;  %vm1229_vm11 = vcmp.eq.s32.totalorder %v2972_v16, %v2720_v53  ;;  %v1289_v5 = vsel %vm1227_vm10, %v2725_v54, 0.0  ;;  %vm1406_vm12 = vcmp.eq.s32.totalorder %v2775_v30, %v2729_v55 }
  0xb8   : > { %v1166_v49 = vadd.f32 %v1112_v46, %v987_v41  ;;  %v1291_v26 = vsel %vm1229_vm11, %v2725_v54, 0.0  ;;  %vm1408_vm13 = vcmp.eq.s32.totalorder %v2972_v16, %v2729_v55  ;;  %v1468_v13 = vsel %vm1406_vm12, %v2734_v56, 0.0 }
  0xb9   : > { %v1343_v14 = vadd.f32 %v1289_v5, %v1164_v8  ;;  %v1470_v27 = vsel %vm1408_vm13, %v2734_v56, 0.0  ;;  %vm1585_vm14 = vcmp.eq.s32.totalorder %v2775_v30, %v2737_v15  ;;  %vm1587_vm15 = vcmp.eq.s32.totalorder %v2972_v16, %v2737_v15 }
  0xba   : > { %v1345_v29 = vadd.f32 %v1291_v26, %v1166_v49  ;;  %v1647_v57 = vsel %vm1585_vm14, %v2760_v6, 0.0  ;;  %v1649_v40 = vsel %vm1587_vm15, %v2760_v6, 0.0  ;;  %v3071_v43 = vadd.s32 64, %v2484_v2 }
  0xbb   : > { %v1522_v58 = vadd.f32 %v1468_v13, %v1343_v14  ;;  %v3074_v44 = vadd.s32 72, %v2484_v2  ;;  %v3077_v10 = vadd.s32 80, %v2484_v2  ;;  %v3080_v30 = vadd.s32 88, %v2484_v2 }
  0xbc   : > { %v1524_v52 = vadd.f32 %v1470_v27, %v1345_v29  ;;  %vm391_vm0 = vcmp.eq.s32.totalorder %v3071_v43, %v2522_v17  ;;  %vm516_vm1 = vcmp.eq.s32.totalorder %v3071_v43, %v2530_v19  ;;  %vm695_vm2 = vcmp.eq.s32.totalorder %v3071_v43, %v2538_v21 }
  0xbd   : > { %v1701_v16 = vadd.f32 %v1647_v57, %v1522_v58  ;;  %vm393_vm3 = vcmp.eq.s32.totalorder %v3074_v44, %v2522_v17  ;;  %v453_v63 = vsel %vm391_vm0, %v2526_v18, 0.0  ;;  %vm518_vm4 = vcmp.eq.s32.totalorder %v3074_v44, %v2530_v19 }
  0xbe   : > { %v1703_v0 = vadd.f32 %v1649_v40, %v1524_v52  ;;  %v455_v9 = vsel %vm393_vm3, %v2526_v18, 0.0  ;;  %v578_v28 = vsel %vm516_vm1, %v2534_v20, 0.0  ;;  %v580_v60 = vsel %vm518_vm4, %v2534_v20, 0.0 }
  0xbf   : > { %v632_v61 = vadd.f32 %v578_v28, %v453_v63  ;;  %v634_v31 = vadd.f32 %v580_v60, %v455_v9  ;;  %vm697_vm5 = vcmp.eq.s32.totalorder %v3074_v44, %v2538_v21  ;;  %v757_v32 = vsel %vm695_vm2, %v2543_v22, 0.0 }
  0xc0   : > { %v1750_v33 = vpack.c.bf16 %v1703_v0, %v1701_v16  ;;  %v759_v34 = vsel %vm697_vm5, %v2543_v22, 0.0  ;;  %vm874_vm6 = vcmp.eq.s32.totalorder %v3071_v43, %v2547_v23  ;;  %vm876_vm7 = vcmp.eq.s32.totalorder %v3074_v44, %v2547_v23 }
  0xc1   : > { %v811_v36 = vadd.f32 %v757_v32, %v632_v61  ;;  %v813_v41 = vadd.f32 %v759_v34, %v634_v31  ;;  %v936_v45 = vsel %vm874_vm6, %v2552_v24, 0.0  ;;  %v938_v46 = vsel %vm876_vm7, %v2552_v24, 0.0 }
  0xc2   : > { %1800 = vmatpush1.bf16.msra.mxu0 %v1750_v33  ;;  %vm1053_vm8 = vcmp.eq.s32.totalorder %v3071_v43, %v2580_v37  ;;  %vm1055_vm9 = vcmp.eq.s32.totalorder %v3074_v44, %v2580_v37  ;;  %vm1232_vm10 = vcmp.eq.s32.totalorder %v3071_v43, %v2589_v39  ;;  %vm1234_vm11 = vcmp.eq.s32.totalorder %v3074_v44, %v2589_v39 }
  0xc3   : > { %v990_v8 = vadd.f32 %v936_v45, %v811_v36  ;;  %v992_v5 = vadd.f32 %v938_v46, %v813_v41  ;;  %v1115_v49 = vsel %vm1053_vm8, %v2585_v38, 0.0  ;;  %v1117_v26 = vsel %vm1055_vm9, %v2585_v38, 0.0 }
  0xc4   : > { %v1294_v13 = vsel %vm1232_vm10, %v2609_v47, 0.0  ;;  %v1296_v14 = vsel %vm1234_vm11, %v2609_v47, 0.0  ;;  %vm1411_vm12 = vcmp.eq.s32.totalorder %v3071_v43, %v2613_v48  ;;  %vm1413_vm13 = vcmp.eq.s32.totalorder %v3074_v44, %v2613_v48 }
  0xc5   : > { %v1169_v27 = vadd.f32 %v1115_v49, %v990_v8  ;;  %v1171_v29 = vadd.f32 %v1117_v26, %v992_v5  ;;  %v1473_v57 = vsel %vm1411_vm12, %v2618_v51, 0.0  ;;  %v1475_v40 = vsel %vm1413_vm13, %v2618_v51, 0.0 }
  0xc6   : > { %vm1590_vm14 = vcmp.eq.s32.totalorder %v3071_v43, %v2630_v59  ;;  %vm1592_vm15 = vcmp.eq.s32.totalorder %v3074_v44, %v2630_v59  ;;  %vm390_vm0 = vcmp.eq.s32.totalorder %v3071_v43, %v2638_v62  ;;  %vm392_vm1 = vcmp.eq.s32.totalorder %v3074_v44, %v2638_v62 }
  0xc7   : > { %v1348_v58 = vadd.f32 %v1294_v13, %v1169_v27  ;;  %v1350_v52 = vadd.f32 %v1296_v14, %v1171_v29  ;;  %v1652_v16 = vsel %vm1590_vm14, %v2655_v3, 0.0  ;;  %v1654_v63 = vsel %vm1592_vm15, %v2655_v3, 0.0 }
  0xc8   : > { %v452_v0 = vsel %vm390_vm0, %v2663_v4, 0.0  ;;  %v454_v9 = vsel %vm392_vm1, %v2663_v4, 0.0  ;;  %vm515_vm2 = vcmp.eq.s32.totalorder %v3071_v43, %v2642_v1  ;;  %vm517_vm3 = vcmp.eq.s32.totalorder %v3074_v44, %v2642_v1 }
  0xc9   : > { %v1527_v28 = vadd.f32 %v1473_v57, %v1348_v58  ;;  %v1529_v60 = vadd.f32 %v1475_v40, %v1350_v52  ;;  %v577_v61 = vsel %vm515_vm2, %v2673_v7, 0.0  ;;  %v579_v31 = vsel %vm517_vm3, %v2673_v7, 0.0 }
  0xca   : > { %v631_v32 = vadd.f32 %v577_v61, %v452_v0  ;;  %v633_v33 = vadd.f32 %v579_v31, %v454_v9  ;;  %vm694_vm4 = vcmp.eq.s32.totalorder %v3071_v43, %v2646_v25  ;;  %vm696_vm5 = vcmp.eq.s32.totalorder %v3074_v44, %v2646_v25 }
  0xcb   : > { %v1706_v34 = vadd.f32 %v1652_v16, %v1527_v28  ;;  %v1708_v36 = vadd.f32 %v1654_v63, %v1529_v60  ;;  %v756_v41 = vsel %vm694_vm4, %v2686_v11, 0.0  ;;  %v758_v45 = vsel %vm696_vm5, %v2686_v11, 0.0 }
  0xcc   : > { %v810_v46 = vadd.f32 %v756_v41, %v631_v32  ;;  %v812_v8 = vadd.f32 %v758_v45, %v633_v33  ;;  %vm873_vm6 = vcmp.eq.s32.totalorder %v3071_v43, %v2690_v35  ;;  %vm875_vm7 = vcmp.eq.s32.totalorder %v3074_v44, %v2690_v35 }
  0xcd   : > { %v1753_v5 = vpack.c.bf16 %v1708_v36, %v1706_v34  ;;  %v935_v49 = vsel %vm873_vm6, %v2697_v42, 0.0  ;;  %v937_v26 = vsel %vm875_vm7, %v2697_v42, 0.0  ;;  %vm1052_vm8 = vcmp.eq.s32.totalorder %v3071_v43, %v2701_v12 }
  0xce   : > { %v989_v13 = vadd.f32 %v935_v49, %v810_v46  ;;  %v991_v14 = vadd.f32 %v937_v26, %v812_v8  ;;  %vm1054_vm9 = vcmp.eq.s32.totalorder %v3074_v44, %v2701_v12  ;;  %v1114_v27 = vsel %vm1052_vm8, %v2716_v50, 0.0 }
  0xcf   : > { %1801 = vmatprep.subr.bf16.mxu0 %v1753_v5  ;;  %v1116_v29 = vsel %vm1054_vm9, %v2716_v50, 0.0  ;;  %vm1231_vm10 = vcmp.eq.s32.totalorder %v3071_v43, %v2720_v53  ;;  %vm1233_vm11 = vcmp.eq.s32.totalorder %v3074_v44, %v2720_v53  ;;  %vm1410_vm12 = vcmp.eq.s32.totalorder %v3071_v43, %v2729_v55 }
  0xd0   : > { %v1168_v57 = vadd.f32 %v1114_v27, %v989_v13  ;;  %v1170_v40 = vadd.f32 %v1116_v29, %v991_v14  ;;  %v1293_v58 = vsel %vm1231_vm10, %v2725_v54, 0.0  ;;  %v1295_v52 = vsel %vm1233_vm11, %v2725_v54, 0.0 }
  0xd1   : > { %vm1412_vm13 = vcmp.eq.s32.totalorder %v3074_v44, %v2729_v55  ;;  %v1472_v16 = vsel %vm1410_vm12, %v2734_v56, 0.0  ;;  %vm1589_vm14 = vcmp.eq.s32.totalorder %v3071_v43, %v2737_v15  ;;  %vm1591_vm15 = vcmp.eq.s32.totalorder %v3074_v44, %v2737_v15 }
  0xd2   : > { %v1347_v63 = vadd.f32 %v1293_v58, %v1168_v57  ;;  %v1349_v0 = vadd.f32 %v1295_v52, %v1170_v40  ;;  %v1474_v9 = vsel %vm1412_vm13, %v2734_v56, 0.0  ;;  %v1651_v28 = vsel %vm1589_vm14, %v2760_v6, 0.0 }
  0xd3   : > { %v1653_v60 = vsel %vm1591_vm15, %v2760_v6, 0.0  ;;  %vm395_vm0 = vcmp.eq.s32.totalorder %v3077_v10, %v2522_v17  ;;  %vm397_vm1 = vcmp.eq.s32.totalorder %v3080_v30, %v2522_v17  ;;  %vm520_vm2 = vcmp.eq.s32.totalorder %v3077_v10, %v2530_v19 }
  0xd4   : > { %v1526_v43 = vadd.f32 %v1472_v16, %v1347_v63  ;;  %v1528_v61 = vadd.f32 %v1474_v9, %v1349_v0  ;;  %v457_v44 = vsel %vm395_vm0, %v2526_v18, 0.0  ;;  %v459_v31 = vsel %vm397_vm1, %v2526_v18, 0.0 }
  0xd5   : > { %vm522_vm3 = vcmp.eq.s32.totalorder %v3080_v30, %v2530_v19  ;;  %v582_v32 = vsel %vm520_vm2, %v2534_v20, 0.0  ;;  %vm699_vm4 = vcmp.eq.s32.totalorder %v3077_v10, %v2538_v21  ;;  %vm701_vm5 = vcmp.eq.s32.totalorder %v3080_v30, %v2538_v21 }
  0xd6   : > { %v1705_v33 = vadd.f32 %v1651_v28, %v1526_v43  ;;  %v1707_v34 = vadd.f32 %v1653_v60, %v1528_v61  ;;  %v584_v36 = vsel %vm522_vm3, %v2534_v20, 0.0  ;;  %v636_v41 = vadd.f32 %v582_v32, %v457_v44 }
  0xd7   : > { %v638_v45 = vadd.f32 %v584_v36, %v459_v31  ;;  %v761_v46 = vsel %vm699_vm4, %v2543_v22, 0.0  ;;  %v763_v8 = vsel %vm701_vm5, %v2543_v22, 0.0  ;;  %vm878_vm6 = vcmp.eq.s32.totalorder %v3077_v10, %v2547_v23 }
  0xd8   : > { %v1752_v5 = vpack.c.bf16 %v1707_v34, %v1705_v33  ;;  %v815_v49 = vadd.f32 %v761_v46, %v636_v41  ;;  %vm880_vm7 = vcmp.eq.s32.totalorder %v3080_v30, %v2547_v23  ;;  %v940_v26 = vsel %vm878_vm6, %v2552_v24, 0.0 }
  0xd9   : > { %v817_v13 = vadd.f32 %v763_v8, %v638_v45  ;;  %v942_v14 = vsel %vm880_vm7, %v2552_v24, 0.0  ;;  %vm1057_vm8 = vcmp.eq.s32.totalorder %v3077_v10, %v2580_v37  ;;  %vm1059_vm9 = vcmp.eq.s32.totalorder %v3080_v30, %v2580_v37 }
  0xda   : > { %1802 = vmatpush1.bf16.msra.mxu0 %v1752_v5  ;;  %v994_v27 = vadd.f32 %v940_v26, %v815_v49  ;;  %v1119_v29 = vsel %vm1057_vm8, %v2585_v38, 0.0  ;;  %v1121_v57 = vsel %vm1059_vm9, %v2585_v38, 0.0  ;;  %vm1236_vm10 = vcmp.eq.s32.totalorder %v3077_v10, %v2589_v39 }
  0xdb   : > { %v996_v40 = vadd.f32 %v942_v14, %v817_v13  ;;  %vm1238_vm11 = vcmp.eq.s32.totalorder %v3080_v30, %v2589_v39  ;;  %v1298_v58 = vsel %vm1236_vm10, %v2609_v47, 0.0  ;;  %vm1415_vm12 = vcmp.eq.s32.totalorder %v3077_v10, %v2613_v48 }
  0xdc   : > { %v1173_v52 = vadd.f32 %v1119_v29, %v994_v27  ;;  %v1300_v16 = vsel %vm1238_vm11, %v2609_v47, 0.0  ;;  %vm1417_vm13 = vcmp.eq.s32.totalorder %v3080_v30, %v2613_v48  ;;  %v1477_v63 = vsel %vm1415_vm12, %v2618_v51, 0.0 }
  0xdd   : > { %v1175_v0 = vadd.f32 %v1121_v57, %v996_v40  ;;  %v1479_v9 = vsel %vm1417_vm13, %v2618_v51, 0.0  ;;  %vm1594_vm14 = vcmp.eq.s32.totalorder %v3077_v10, %v2630_v59  ;;  %vm1596_vm15 = vcmp.eq.s32.totalorder %v3080_v30, %v2630_v59 }
  0xde   : > { %v1352_v28 = vadd.f32 %v1298_v58, %v1173_v52  ;;  %v1656_v60 = vsel %vm1594_vm14, %v2655_v3, 0.0  ;;  %v1658_v43 = vsel %vm1596_vm15, %v2655_v3, 0.0  ;;  %vm394_vm0 = vcmp.eq.s32.totalorder %v3077_v10, %v2638_v62 }
  0xdf   : > { %v1354_v61 = vadd.f32 %v1300_v16, %v1175_v0  ;;  %vm396_vm1 = vcmp.eq.s32.totalorder %v3080_v30, %v2638_v62  ;;  %v456_v44 = vsel %vm394_vm0, %v2663_v4, 0.0  ;;  %vm519_vm2 = vcmp.eq.s32.totalorder %v3077_v10, %v2642_v1 }
  0xe0   : > { %v1531_v31 = vadd.f32 %v1477_v63, %v1352_v28  ;;  %v458_v32 = vsel %vm396_vm1, %v2663_v4, 0.0  ;;  %vm521_vm3 = vcmp.eq.s32.totalorder %v3080_v30, %v2642_v1  ;;  %v581_v33 = vsel %vm519_vm2, %v2673_v7, 0.0 }
  0xe1   : > { %v1533_v34 = vadd.f32 %v1479_v9, %v1354_v61  ;;  %v583_v36 = vsel %vm521_vm3, %v2673_v7, 0.0  ;;  %v635_v41 = vadd.f32 %v581_v33, %v456_v44  ;;  %vm698_vm4 = vcmp.eq.s32.totalorder %v3077_v10, %v2646_v25 }
  0xe2   : > { %v1710_v45 = vadd.f32 %v1656_v60, %v1531_v31  ;;  %v637_v46 = vadd.f32 %v583_v36, %v458_v32  ;;  %vm700_vm5 = vcmp.eq.s32.totalorder %v3080_v30, %v2646_v25  ;;  %v760_v8 = vsel %vm698_vm4, %v2686_v11, 0.0 }
  0xe3   : > { %v1712_v5 = vadd.f32 %v1658_v43, %v1533_v34  ;;  %v762_v49 = vsel %vm700_vm5, %v2686_v11, 0.0  ;;  %v814_v26 = vadd.f32 %v760_v8, %v635_v41  ;;  %vm877_vm6 = vcmp.eq.s32.totalorder %v3077_v10, %v2690_v35 }
  0xe4   : > { %v816_v13 = vadd.f32 %v762_v49, %v637_v46  ;;  %vm879_vm7 = vcmp.eq.s32.totalorder %v3080_v30, %v2690_v35  ;;  %v939_v14 = vsel %vm877_vm6, %v2697_v42, 0.0  ;;  %vm1056_vm8 = vcmp.eq.s32.totalorder %v3077_v10, %v2701_v12 }
  0xe5   : > { %v1755_v27 = vpack.c.bf16 %v1712_v5, %v1710_v45  ;;  %v941_v29 = vsel %vm879_vm7, %v2697_v42, 0.0  ;;  %v993_v57 = vadd.f32 %v939_v14, %v814_v26  ;;  %vm1058_vm9 = vcmp.eq.s32.totalorder %v3080_v30, %v2701_v12 }
  0xe6   : > { %v995_v40 = vadd.f32 %v941_v29, %v816_v13  ;;  %v1118_v58 = vsel %vm1056_vm8, %v2716_v50, 0.0  ;;  %v1120_v52 = vsel %vm1058_vm9, %v2716_v50, 0.0  ;;  %vm1235_vm10 = vcmp.eq.s32.totalorder %v3077_v10, %v2720_v53 }
  0xe7   : > { %1803 = vmatprep.subr.bf16.mxu0 %v1755_v27  ;;  %v1172_v16 = vadd.f32 %v1118_v58, %v993_v57  ;;  %vm1237_vm11 = vcmp.eq.s32.totalorder %v3080_v30, %v2720_v53  ;;  %v1297_v63 = vsel %vm1235_vm10, %v2725_v54, 0.0  ;;  %vm1414_vm12 = vcmp.eq.s32.totalorder %v3077_v10, %v2729_v55 }
  0xe8   : > { %v1174_v0 = vadd.f32 %v1120_v52, %v995_v40  ;;  %v1299_v9 = vsel %vm1237_vm11, %v2725_v54, 0.0  ;;  %vm1416_vm13 = vcmp.eq.s32.totalorder %v3080_v30, %v2729_v55  ;;  %v1476_v28 = vsel %vm1414_vm12, %v2734_v56, 0.0 }
  0xe9   : > { %v1351_v60 = vadd.f32 %v1297_v63, %v1172_v16  ;;  %v1478_v43 = vsel %vm1416_vm13, %v2734_v56, 0.0  ;;  %vm1593_vm14 = vcmp.eq.s32.totalorder %v3077_v10, %v2737_v15  ;;  %vm1595_vm15 = vcmp.eq.s32.totalorder %v3080_v30, %v2737_v15 }
  0xea   : > { %v1353_v61 = vadd.f32 %v1299_v9, %v1174_v0  ;;  %v1655_v44 = vsel %vm1593_vm14, %v2760_v6, 0.0  ;;  %v1657_v31 = vsel %vm1595_vm15, %v2760_v6, 0.0  ;;  %v3275_v32 = vadd.s32 96, %v2484_v2 }
  0xeb   : > { %v1530_v33 = vadd.f32 %v1476_v28, %v1351_v60  ;;  %v3278_v34 = vadd.s32 104, %v2484_v2  ;;  %v3281_v36 = vadd.s32 112, %v2484_v2  ;;  %v3284_v10 = vadd.s32 120, %v2484_v2 }
  0xec   : > { %v1532_v41 = vadd.f32 %v1478_v43, %v1353_v61  ;;  %vm399_vm0 = vcmp.eq.s32.totalorder %v3275_v32, %v2522_v17  ;;  %vm524_vm1 = vcmp.eq.s32.totalorder %v3275_v32, %v2530_v19  ;;  %vm703_vm2 = vcmp.eq.s32.totalorder %v3275_v32, %v2538_v21 }
  0xed   : > { %v1709_v30 = vadd.f32 %v1655_v44, %v1530_v33  ;;  %vm401_vm3 = vcmp.eq.s32.totalorder %v3278_v34, %v2522_v17  ;;  %v461_v45 = vsel %vm399_vm0, %v2526_v18, 0.0  ;;  %vm526_vm4 = vcmp.eq.s32.totalorder %v3278_v34, %v2530_v19 }
  0xee   : > { %v1711_v46 = vadd.f32 %v1657_v31, %v1532_v41  ;;  %v463_v8 = vsel %vm401_vm3, %v2526_v18, 0.0  ;;  %v586_v5 = vsel %vm524_vm1, %v2534_v20, 0.0  ;;  %v588_v49 = vsel %vm526_vm4, %v2534_v20, 0.0 }
  0xef   : > { %v640_v26 = vadd.f32 %v586_v5, %v461_v45  ;;  %v642_v13 = vadd.f32 %v588_v49, %v463_v8  ;;  %vm705_vm5 = vcmp.eq.s32.totalorder %v3278_v34, %v2538_v21  ;;  %v765_v14 = vsel %vm703_vm2, %v2543_v22, 0.0 }
  0xf0   : > { %v1754_v27 = vpack.c.bf16 %v1711_v46, %v1709_v30  ;;  %v767_v29 = vsel %vm705_vm5, %v2543_v22, 0.0  ;;  %vm882_vm6 = vcmp.eq.s32.totalorder %v3275_v32, %v2547_v23  ;;  %vm884_vm7 = vcmp.eq.s32.totalorder %v3278_v34, %v2547_v23 }
  0xf1   : > { %v819_v57 = vadd.f32 %v765_v14, %v640_v26  ;;  %v821_v40 = vadd.f32 %v767_v29, %v642_v13  ;;  %v944_v58 = vsel %vm882_vm6, %v2552_v24, 0.0  ;;  %v946_v52 = vsel %vm884_vm7, %v2552_v24, 0.0 }
  0xf2   : > { %1804 = vmatpush1.bf16.msra.mxu0 %v1754_v27  ;;  %vm1061_vm8 = vcmp.eq.s32.totalorder %v3275_v32, %v2580_v37  ;;  %vm1063_vm9 = vcmp.eq.s32.totalorder %v3278_v34, %v2580_v37  ;;  %vm1240_vm10 = vcmp.eq.s32.totalorder %v3275_v32, %v2589_v39  ;;  %vm1242_vm11 = vcmp.eq.s32.totalorder %v3278_v34, %v2589_v39 }
  0xf3   : > { %v998_v16 = vadd.f32 %v944_v58, %v819_v57  ;;  %v1000_v63 = vadd.f32 %v946_v52, %v821_v40  ;;  %v1123_v0 = vsel %vm1061_vm8, %v2585_v38, 0.0  ;;  %v1125_v9 = vsel %vm1063_vm9, %v2585_v38, 0.0 }
  0xf4   : > { %v1302_v28 = vsel %vm1240_vm10, %v2609_v47, 0.0  ;;  %v1304_v60 = vsel %vm1242_vm11, %v2609_v47, 0.0  ;;  %vm1419_vm12 = vcmp.eq.s32.totalorder %v3275_v32, %v2613_v48  ;;  %vm1421_vm13 = vcmp.eq.s32.totalorder %v3278_v34, %v2613_v48 }
  0xf5   : > { %v1177_v43 = vadd.f32 %v1123_v0, %v998_v16  ;;  %v1179_v61 = vadd.f32 %v1125_v9, %v1000_v63  ;;  %v1481_v44 = vsel %vm1419_vm12, %v2618_v51, 0.0  ;;  %v1483_v31 = vsel %vm1421_vm13, %v2618_v51, 0.0 }
  0xf6   : > { %vm1598_vm14 = vcmp.eq.s32.totalorder %v3275_v32, %v2630_v59  ;;  %vm1600_vm15 = vcmp.eq.s32.totalorder %v3278_v34, %v2630_v59  ;;  %vm398_vm0 = vcmp.eq.s32.totalorder %v3275_v32, %v2638_v62  ;;  %vm400_vm1 = vcmp.eq.s32.totalorder %v3278_v34, %v2638_v62 }
  0xf7   : > { %v1356_v33 = vadd.f32 %v1302_v28, %v1177_v43  ;;  %v1358_v41 = vadd.f32 %v1304_v60, %v1179_v61  ;;  %v1660_v30 = vsel %vm1598_vm14, %v2655_v3, 0.0  ;;  %v1662_v45 = vsel %vm1600_vm15, %v2655_v3, 0.0 }
  0xf8   : > { %v460_v46 = vsel %vm398_vm0, %v2663_v4, 0.0  ;;  %v462_v8 = vsel %vm400_vm1, %v2663_v4, 0.0  ;;  %vm523_vm2 = vcmp.eq.s32.totalorder %v3275_v32, %v2642_v1  ;;  %vm525_vm3 = vcmp.eq.s32.totalorder %v3278_v34, %v2642_v1 }
  0xf9   : > { %v1535_v5 = vadd.f32 %v1481_v44, %v1356_v33  ;;  %v1537_v49 = vadd.f32 %v1483_v31, %v1358_v41  ;;  %v585_v26 = vsel %vm523_vm2, %v2673_v7, 0.0  ;;  %v587_v13 = vsel %vm525_vm3, %v2673_v7, 0.0 }
  0xfa   : > { %v639_v14 = vadd.f32 %v585_v26, %v460_v46  ;;  %v641_v27 = vadd.f32 %v587_v13, %v462_v8  ;;  %vm702_vm4 = vcmp.eq.s32.totalorder %v3275_v32, %v2646_v25  ;;  %vm704_vm5 = vcmp.eq.s32.totalorder %v3278_v34, %v2646_v25 }
  0xfb   : > { %v1714_v29 = vadd.f32 %v1660_v30, %v1535_v5  ;;  %v1716_v57 = vadd.f32 %v1662_v45, %v1537_v49  ;;  %v764_v40 = vsel %vm702_vm4, %v2686_v11, 0.0  ;;  %v766_v58 = vsel %vm704_vm5, %v2686_v11, 0.0 }
  0xfc   : > { %v818_v52 = vadd.f32 %v764_v40, %v639_v14  ;;  %v820_v16 = vadd.f32 %v766_v58, %v641_v27  ;;  %vm881_vm6 = vcmp.eq.s32.totalorder %v3275_v32, %v2690_v35  ;;  %vm883_vm7 = vcmp.eq.s32.totalorder %v3278_v34, %v2690_v35 }
  0xfd   : > { %v1757_v63 = vpack.c.bf16 %v1716_v57, %v1714_v29  ;;  %v943_v0 = vsel %vm881_vm6, %v2697_v42, 0.0  ;;  %v945_v9 = vsel %vm883_vm7, %v2697_v42, 0.0  ;;  %vm1060_vm8 = vcmp.eq.s32.totalorder %v3275_v32, %v2701_v12 }
  0xfe   : > { %v997_v28 = vadd.f32 %v943_v0, %v818_v52  ;;  %v999_v60 = vadd.f32 %v945_v9, %v820_v16  ;;  %vm1062_vm9 = vcmp.eq.s32.totalorder %v3278_v34, %v2701_v12  ;;  %v1122_v43 = vsel %vm1060_vm8, %v2716_v50, 0.0 }
  0xff   : > { %1805 = vmatprep.subr.bf16.mxu0 %v1757_v63  ;;  %v1124_v61 = vsel %vm1062_vm9, %v2716_v50, 0.0  ;;  %vm1239_vm10 = vcmp.eq.s32.totalorder %v3275_v32, %v2720_v53  ;;  %vm1241_vm11 = vcmp.eq.s32.totalorder %v3278_v34, %v2720_v53  ;;  %vm1418_vm12 = vcmp.eq.s32.totalorder %v3275_v32, %v2729_v55 }
 0x100   : > { %v1176_v44 = vadd.f32 %v1122_v43, %v997_v28  ;;  %v1178_v31 = vadd.f32 %v1124_v61, %v999_v60  ;;  %v1301_v33 = vsel %vm1239_vm10, %v2725_v54, 0.0  ;;  %v1303_v41 = vsel %vm1241_vm11, %v2725_v54, 0.0 }
 0x101   : > { %vm1420_vm13 = vcmp.eq.s32.totalorder %v3278_v34, %v2729_v55  ;;  %v1480_v30 = vsel %vm1418_vm12, %v2734_v56, 0.0  ;;  %vm1597_vm14 = vcmp.eq.s32.totalorder %v3275_v32, %v2737_v15  ;;  %vm1599_vm15 = vcmp.eq.s32.totalorder %v3278_v34, %v2737_v15 }
 0x102   : > { %v1355_v45 = vadd.f32 %v1301_v33, %v1176_v44  ;;  %v1357_v46 = vadd.f32 %v1303_v41, %v1178_v31  ;;  %v1482_v8 = vsel %vm1420_vm13, %v2734_v56, 0.0  ;;  %v1659_v5 = vsel %vm1597_vm14, %v2760_v6, 0.0 }
 0x103   : > { %v1661_v49 = vsel %vm1599_vm15, %v2760_v6, 0.0  ;;  %vm403_vm0 = vcmp.eq.s32.totalorder %v3281_v36, %v2522_v17  ;;  %vm405_vm1 = vcmp.eq.s32.totalorder %v3284_v10, %v2522_v17  ;;  %vm528_vm2 = vcmp.eq.s32.totalorder %v3281_v36, %v2530_v19 }
 0x104   : > { %v1534_v32 = vadd.f32 %v1480_v30, %v1355_v45  ;;  %v1536_v26 = vadd.f32 %v1482_v8, %v1357_v46  ;;  %v465_v34 = vsel %vm403_vm0, %v2526_v18, 0.0  ;;  %v467_v13 = vsel %vm405_vm1, %v2526_v18, 0.0 }
 0x105   : > { %vm530_vm3 = vcmp.eq.s32.totalorder %v3284_v10, %v2530_v19  ;;  %v590_v14 = vsel %vm528_vm2, %v2534_v20, 0.0  ;;  %vm707_vm4 = vcmp.eq.s32.totalorder %v3281_v36, %v2538_v21  ;;  %vm709_vm5 = vcmp.eq.s32.totalorder %v3284_v10, %v2538_v21 }
 0x106   : > { %v1713_v27 = vadd.f32 %v1659_v5, %v1534_v32  ;;  %v1715_v29 = vadd.f32 %v1661_v49, %v1536_v26  ;;  %v592_v57 = vsel %vm530_vm3, %v2534_v20, 0.0  ;;  %v644_v40 = vadd.f32 %v590_v14, %v465_v34 }
 0x107   : > { %v646_v58 = vadd.f32 %v592_v57, %v467_v13  ;;  %v769_v52 = vsel %vm707_vm4, %v2543_v22, 0.0  ;;  %v771_v16 = vsel %vm709_vm5, %v2543_v22, 0.0  ;;  %vm886_vm6 = vcmp.eq.s32.totalorder %v3281_v36, %v2547_v23 }
 0x108   : > { %v1756_v63 = vpack.c.bf16 %v1715_v29, %v1713_v27  ;;  %v823_v0 = vadd.f32 %v769_v52, %v644_v40  ;;  %vm888_vm7 = vcmp.eq.s32.totalorder %v3284_v10, %v2547_v23  ;;  %v948_v9 = vsel %vm886_vm6, %v2552_v24, 0.0 }
 0x109   : > { %v825_v28 = vadd.f32 %v771_v16, %v646_v58  ;;  %v950_v60 = vsel %vm888_vm7, %v2552_v24, 0.0  ;;  %vm1065_vm8 = vcmp.eq.s32.totalorder %v3281_v36, %v2580_v37  ;;  %vm1067_vm9 = vcmp.eq.s32.totalorder %v3284_v10, %v2580_v37 }
 0x10a   : > { %1806 = vmatpush1.bf16.msra.mxu0 %v1756_v63  ;;  %v1002_v43 = vadd.f32 %v948_v9, %v823_v0  ;;  %v1127_v61 = vsel %vm1065_vm8, %v2585_v38, 0.0  ;;  %v1129_v44 = vsel %vm1067_vm9, %v2585_v38, 0.0  ;;  %vm1244_vm10 = vcmp.eq.s32.totalorder %v3281_v36, %v2589_v39 }
 0x10b   : > { %v1004_v31 = vadd.f32 %v950_v60, %v825_v28  ;;  %vm1246_vm11 = vcmp.eq.s32.totalorder %v3284_v10, %v2589_v39  ;;  %v1306_v33 = vsel %vm1244_vm10, %v2609_v47, 0.0  ;;  %vm1423_vm12 = vcmp.eq.s32.totalorder %v3281_v36, %v2613_v48 }
 0x10c   : > { %v1181_v41 = vadd.f32 %v1127_v61, %v1002_v43  ;;  %v1308_v30 = vsel %vm1246_vm11, %v2609_v47, 0.0  ;;  %vm1425_vm13 = vcmp.eq.s32.totalorder %v3284_v10, %v2613_v48  ;;  %v1485_v45 = vsel %vm1423_vm12, %v2618_v51, 0.0 }
 0x10d   : > { %v1183_v46 = vadd.f32 %v1129_v44, %v1004_v31  ;;  %v1487_v8 = vsel %vm1425_vm13, %v2618_v51, 0.0  ;;  %vm1602_vm14 = vcmp.eq.s32.totalorder %v3281_v36, %v2630_v59  ;;  %vm1604_vm15 = vcmp.eq.s32.totalorder %v3284_v10, %v2630_v59 }
 0x10e   : > { %v1360_v5 = vadd.f32 %v1306_v33, %v1181_v41  ;;  %v1664_v49 = vsel %vm1602_vm14, %v2655_v3, 0.0  ;;  %v1666_v32 = vsel %vm1604_vm15, %v2655_v3, 0.0  ;;  %vm402_vm0 = vcmp.eq.s32.totalorder %v3281_v36, %v2638_v62 }
 0x10f   : > { %v1362_v26 = vadd.f32 %v1308_v30, %v1183_v46  ;;  %vm404_vm1 = vcmp.eq.s32.totalorder %v3284_v10, %v2638_v62  ;;  %v464_v34 = vsel %vm402_vm0, %v2663_v4, 0.0  ;;  %vm527_vm2 = vcmp.eq.s32.totalorder %v3281_v36, %v2642_v1 }
 0x110   : > { %v1539_v13 = vadd.f32 %v1485_v45, %v1360_v5  ;;  %v466_v14 = vsel %vm404_vm1, %v2663_v4, 0.0  ;;  %vm529_vm3 = vcmp.eq.s32.totalorder %v3284_v10, %v2642_v1  ;;  %v589_v27 = vsel %vm527_vm2, %v2673_v7, 0.0 }
 0x111   : > { %v1541_v29 = vadd.f32 %v1487_v8, %v1362_v26  ;;  %v591_v57 = vsel %vm529_vm3, %v2673_v7, 0.0  ;;  %v643_v40 = vadd.f32 %v589_v27, %v464_v34  ;;  %vm706_vm4 = vcmp.eq.s32.totalorder %v3281_v36, %v2646_v25 }
 0x112   : > { %v1718_v58 = vadd.f32 %v1664_v49, %v1539_v13  ;;  %v645_v52 = vadd.f32 %v591_v57, %v466_v14  ;;  %vm708_vm5 = vcmp.eq.s32.totalorder %v3284_v10, %v2646_v25  ;;  %v768_v16 = vsel %vm706_vm4, %v2686_v11, 0.0 }
 0x113   : > { %v1720_v63 = vadd.f32 %v1666_v32, %v1541_v29  ;;  %v770_v0 = vsel %vm708_vm5, %v2686_v11, 0.0  ;;  %v822_v9 = vadd.f32 %v768_v16, %v643_v40  ;;  %vm885_vm6 = vcmp.eq.s32.totalorder %v3281_v36, %v2690_v35 }
 0x114   : > { %v824_v28 = vadd.f32 %v770_v0, %v645_v52  ;;  %vm887_vm7 = vcmp.eq.s32.totalorder %v3284_v10, %v2690_v35  ;;  %v947_v60 = vsel %vm885_vm6, %v2697_v42, 0.0  ;;  %vm1064_vm8 = vcmp.eq.s32.totalorder %v3281_v36, %v2701_v12 }
 0x115   : > { %v1759_v43 = vpack.c.bf16 %v1720_v63, %v1718_v58  ;;  %v949_v61 = vsel %vm887_vm7, %v2697_v42, 0.0  ;;  %v1001_v44 = vadd.f32 %v947_v60, %v822_v9  ;;  %vm1066_vm9 = vcmp.eq.s32.totalorder %v3284_v10, %v2701_v12 }
 0x116   : > { %v1003_v31 = vadd.f32 %v949_v61, %v824_v28  ;;  %v1126_v33 = vsel %vm1064_vm8, %v2716_v50, 0.0  ;;  %v1128_v41 = vsel %vm1066_vm9, %v2716_v50, 0.0  ;;  %vm1243_vm10 = vcmp.eq.s32.totalorder %v3281_v36, %v2720_v53 }
 0x117   : > { %1807 = vmatprep.subr.bf16.mxu0 %v1759_v43  ;;  %v1180_v30 = vadd.f32 %v1126_v33, %v1001_v44  ;;  %vm1245_vm11 = vcmp.eq.s32.totalorder %v3284_v10, %v2720_v53  ;;  %v1305_v45 = vsel %vm1243_vm10, %v2725_v54, 0.0  ;;  %vm1422_vm12 = vcmp.eq.s32.totalorder %v3281_v36, %v2729_v55 }
 0x118   : > { %v1182_v46 = vadd.f32 %v1128_v41, %v1003_v31  ;;  %v1307_v8 = vsel %vm1245_vm11, %v2725_v54, 0.0  ;;  %vm1424_vm13 = vcmp.eq.s32.totalorder %v3284_v10, %v2729_v55  ;;  %v1484_v5 = vsel %vm1422_vm12, %v2734_v56, 0.0 }
 0x119   : > { %v1359_v49 = vadd.f32 %v1305_v45, %v1180_v30  ;;  %v1486_v32 = vsel %vm1424_vm13, %v2734_v56, 0.0  ;;  %vm1601_vm14 = vcmp.eq.s32.totalorder %v3281_v36, %v2737_v15  ;;  %vm1603_vm15 = vcmp.eq.s32.totalorder %v3284_v10, %v2737_v15 }
 0x11a   : > { %v1361_v26 = vadd.f32 %v1307_v8, %v1182_v46  ;;  %v1663_v34 = vsel %vm1601_vm14, %v2760_v6, 0.0  ;;  %v1665_v13 = vsel %vm1603_vm15, %v2760_v6, 0.0  ;;  %v3479_v14 = vadd.s32 128, %v2484_v2 }
 0x11b   : > { %v1538_v27 = vadd.f32 %v1484_v5, %v1359_v49  ;;  %v3482_v29 = vadd.s32 136, %v2484_v2  ;;  %v3485_v57 = vadd.s32 144, %v2484_v2  ;;  %v3488_v36 = vadd.s32 152, %v2484_v2 }
 0x11c   : > { %v1540_v40 = vadd.f32 %v1486_v32, %v1361_v26  ;;  %vm407_vm0 = vcmp.eq.s32.totalorder %v3479_v14, %v2522_v17  ;;  %vm532_vm1 = vcmp.eq.s32.totalorder %v3479_v14, %v2530_v19  ;;  %vm711_vm2 = vcmp.eq.s32.totalorder %v3479_v14, %v2538_v21 }
 0x11d   : > { %v1717_v10 = vadd.f32 %v1663_v34, %v1538_v27  ;;  %vm409_vm3 = vcmp.eq.s32.totalorder %v3482_v29, %v2522_v17  ;;  %v469_v58 = vsel %vm407_vm0, %v2526_v18, 0.0  ;;  %vm534_vm4 = vcmp.eq.s32.totalorder %v3482_v29, %v2530_v19 }
 0x11e   : > { %v1719_v52 = vadd.f32 %v1665_v13, %v1540_v40  ;;  %v471_v16 = vsel %vm409_vm3, %v2526_v18, 0.0  ;;  %v594_v63 = vsel %vm532_vm1, %v2534_v20, 0.0  ;;  %v596_v0 = vsel %vm534_vm4, %v2534_v20, 0.0 }
 0x11f   : > { %v648_v9 = vadd.f32 %v594_v63, %v469_v58  ;;  %v650_v28 = vadd.f32 %v596_v0, %v471_v16  ;;  %vm713_vm5 = vcmp.eq.s32.totalorder %v3482_v29, %v2538_v21  ;;  %v773_v60 = vsel %vm711_vm2, %v2543_v22, 0.0 }
 0x120   : > { %v1758_v43 = vpack.c.bf16 %v1719_v52, %v1717_v10  ;;  %v775_v61 = vsel %vm713_vm5, %v2543_v22, 0.0  ;;  %vm890_vm6 = vcmp.eq.s32.totalorder %v3479_v14, %v2547_v23  ;;  %vm892_vm7 = vcmp.eq.s32.totalorder %v3482_v29, %v2547_v23 }
 0x121   : > { %v827_v44 = vadd.f32 %v773_v60, %v648_v9  ;;  %v829_v31 = vadd.f32 %v775_v61, %v650_v28  ;;  %v952_v33 = vsel %vm890_vm6, %v2552_v24, 0.0  ;;  %v954_v41 = vsel %vm892_vm7, %v2552_v24, 0.0 }
 0x122   : > { %1808 = vmatpush1.bf16.msra.mxu0 %v1758_v43  ;;  %vm1069_vm8 = vcmp.eq.s32.totalorder %v3479_v14, %v2580_v37  ;;  %vm1071_vm9 = vcmp.eq.s32.totalorder %v3482_v29, %v2580_v37  ;;  %vm1248_vm10 = vcmp.eq.s32.totalorder %v3479_v14, %v2589_v39  ;;  %vm1250_vm11 = vcmp.eq.s32.totalorder %v3482_v29, %v2589_v39 }
 0x123   : > { %v1006_v30 = vadd.f32 %v952_v33, %v827_v44  ;;  %v1008_v45 = vadd.f32 %v954_v41, %v829_v31  ;;  %v1131_v46 = vsel %vm1069_vm8, %v2585_v38, 0.0  ;;  %v1133_v8 = vsel %vm1071_vm9, %v2585_v38, 0.0 }
 0x124   : > { %v1310_v5 = vsel %vm1248_vm10, %v2609_v47, 0.0  ;;  %v1312_v49 = vsel %vm1250_vm11, %v2609_v47, 0.0  ;;  %vm1427_vm12 = vcmp.eq.s32.totalorder %v3479_v14, %v2613_v48  ;;  %vm1429_vm13 = vcmp.eq.s32.totalorder %v3482_v29, %v2613_v48 }
 0x125   : > { %v1185_v32 = vadd.f32 %v1131_v46, %v1006_v30  ;;  %v1187_v26 = vadd.f32 %v1133_v8, %v1008_v45  ;;  %v1489_v34 = vsel %vm1427_vm12, %v2618_v51, 0.0  ;;  %v1491_v13 = vsel %vm1429_vm13, %v2618_v51, 0.0 }
 0x126   : > { %vm1606_vm14 = vcmp.eq.s32.totalorder %v3479_v14, %v2630_v59  ;;  %vm1608_vm15 = vcmp.eq.s32.totalorder %v3482_v29, %v2630_v59  ;;  %vm406_vm0 = vcmp.eq.s32.totalorder %v3479_v14, %v2638_v62  ;;  %vm408_vm1 = vcmp.eq.s32.totalorder %v3482_v29, %v2638_v62 }
 0x127   : > { %v1364_v27 = vadd.f32 %v1310_v5, %v1185_v32  ;;  %v1366_v40 = vadd.f32 %v1312_v49, %v1187_v26  ;;  %v1668_v10 = vsel %vm1606_vm14, %v2655_v3, 0.0  ;;  %v1670_v58 = vsel %vm1608_vm15, %v2655_v3, 0.0 }
 0x128   : > { %v468_v52 = vsel %vm406_vm0, %v2663_v4, 0.0  ;;  %v470_v16 = vsel %vm408_vm1, %v2663_v4, 0.0  ;;  %vm531_vm2 = vcmp.eq.s32.totalorder %v3479_v14, %v2642_v1  ;;  %vm533_vm3 = vcmp.eq.s32.totalorder %v3482_v29, %v2642_v1 }
 0x129   : > { %v1543_v63 = vadd.f32 %v1489_v34, %v1364_v27  ;;  %v1545_v0 = vadd.f32 %v1491_v13, %v1366_v40  ;;  %v593_v9 = vsel %vm531_vm2, %v2673_v7, 0.0  ;;  %v595_v28 = vsel %vm533_vm3, %v2673_v7, 0.0 }
 0x12a   : > { %v647_v60 = vadd.f32 %v593_v9, %v468_v52  ;;  %v649_v43 = vadd.f32 %v595_v28, %v470_v16  ;;  %vm710_vm4 = vcmp.eq.s32.totalorder %v3479_v14, %v2646_v25  ;;  %vm712_vm5 = vcmp.eq.s32.totalorder %v3482_v29, %v2646_v25 }
 0x12b   : > { %v1722_v61 = vadd.f32 %v1668_v10, %v1543_v63  ;;  %v1724_v44 = vadd.f32 %v1670_v58, %v1545_v0  ;;  %v772_v31 = vsel %vm710_vm4, %v2686_v11, 0.0  ;;  %v774_v33 = vsel %vm712_vm5, %v2686_v11, 0.0 }
 0x12c   : > { %v826_v41 = vadd.f32 %v772_v31, %v647_v60  ;;  %v828_v30 = vadd.f32 %v774_v33, %v649_v43  ;;  %vm889_vm6 = vcmp.eq.s32.totalorder %v3479_v14, %v2690_v35  ;;  %vm891_vm7 = vcmp.eq.s32.totalorder %v3482_v29, %v2690_v35 }
 0x12d   : > { %v1761_v45 = vpack.c.bf16 %v1724_v44, %v1722_v61  ;;  %v951_v46 = vsel %vm889_vm6, %v2697_v42, 0.0  ;;  %v953_v8 = vsel %vm891_vm7, %v2697_v42, 0.0  ;;  %vm1068_vm8 = vcmp.eq.s32.totalorder %v3479_v14, %v2701_v12 }
 0x12e   : > { %v1005_v5 = vadd.f32 %v951_v46, %v826_v41  ;;  %v1007_v49 = vadd.f32 %v953_v8, %v828_v30  ;;  %vm1070_vm9 = vcmp.eq.s32.totalorder %v3482_v29, %v2701_v12  ;;  %v1130_v32 = vsel %vm1068_vm8, %v2716_v50, 0.0 }
 0x12f   : > { %1809 = vmatprep.subr.bf16.mxu0 %v1761_v45  ;;  %v1132_v26 = vsel %vm1070_vm9, %v2716_v50, 0.0  ;;  %vm1247_vm10 = vcmp.eq.s32.totalorder %v3479_v14, %v2720_v53  ;;  %vm1249_vm11 = vcmp.eq.s32.totalorder %v3482_v29, %v2720_v53  ;;  %vm1426_vm12 = vcmp.eq.s32.totalorder %v3479_v14, %v2729_v55 }
 0x130   : > { %v1184_v34 = vadd.f32 %v1130_v32, %v1005_v5  ;;  %v1186_v13 = vadd.f32 %v1132_v26, %v1007_v49  ;;  %v1309_v27 = vsel %vm1247_vm10, %v2725_v54, 0.0  ;;  %v1311_v40 = vsel %vm1249_vm11, %v2725_v54, 0.0 }
 0x131   : > { %vm1428_vm13 = vcmp.eq.s32.totalorder %v3482_v29, %v2729_v55  ;;  %v1488_v10 = vsel %vm1426_vm12, %v2734_v56, 0.0  ;;  %vm1605_vm14 = vcmp.eq.s32.totalorder %v3479_v14, %v2737_v15  ;;  %vm1607_vm15 = vcmp.eq.s32.totalorder %v3482_v29, %v2737_v15 }
 0x132   : > { %v1363_v58 = vadd.f32 %v1309_v27, %v1184_v34  ;;  %v1365_v52 = vadd.f32 %v1311_v40, %v1186_v13  ;;  %v1490_v16 = vsel %vm1428_vm13, %v2734_v56, 0.0  ;;  %v1667_v63 = vsel %vm1605_vm14, %v2760_v6, 0.0 }
 0x133   : > { %v1669_v0 = vsel %vm1607_vm15, %v2760_v6, 0.0  ;;  %vm411_vm0 = vcmp.eq.s32.totalorder %v3485_v57, %v2522_v17  ;;  %vm413_vm1 = vcmp.eq.s32.totalorder %v3488_v36, %v2522_v17  ;;  %vm536_vm2 = vcmp.eq.s32.totalorder %v3485_v57, %v2530_v19 }
 0x134   : > { %v1542_v14 = vadd.f32 %v1488_v10, %v1363_v58  ;;  %v1544_v9 = vadd.f32 %v1490_v16, %v1365_v52  ;;  %v473_v29 = vsel %vm411_vm0, %v2526_v18, 0.0  ;;  %v475_v28 = vsel %vm413_vm1, %v2526_v18, 0.0 }
 0x135   : > { %vm538_vm3 = vcmp.eq.s32.totalorder %v3488_v36, %v2530_v19  ;;  %v598_v60 = vsel %vm536_vm2, %v2534_v20, 0.0  ;;  %vm715_vm4 = vcmp.eq.s32.totalorder %v3485_v57, %v2538_v21  ;;  %vm717_vm5 = vcmp.eq.s32.totalorder %v3488_v36, %v2538_v21 }
 0x136   : > { %v1721_v43 = vadd.f32 %v1667_v63, %v1542_v14  ;;  %v1723_v61 = vadd.f32 %v1669_v0, %v1544_v9  ;;  %v600_v44 = vsel %vm538_vm3, %v2534_v20, 0.0  ;;  %v652_v31 = vadd.f32 %v598_v60, %v473_v29 }
 0x137   : > { %v654_v33 = vadd.f32 %v600_v44, %v475_v28  ;;  %v777_v41 = vsel %vm715_vm4, %v2543_v22, 0.0  ;;  %v779_v30 = vsel %vm717_vm5, %v2543_v22, 0.0  ;;  %vm894_vm6 = vcmp.eq.s32.totalorder %v3485_v57, %v2547_v23 }
 0x138   : > { %v1760_v45 = vpack.c.bf16 %v1723_v61, %v1721_v43  ;;  %v831_v46 = vadd.f32 %v777_v41, %v652_v31  ;;  %vm896_vm7 = vcmp.eq.s32.totalorder %v3488_v36, %v2547_v23  ;;  %v956_v8 = vsel %vm894_vm6, %v2552_v24, 0.0 }
 0x139   : > { %v833_v5 = vadd.f32 %v779_v30, %v654_v33  ;;  %v958_v49 = vsel %vm896_vm7, %v2552_v24, 0.0  ;;  %vm1073_vm8 = vcmp.eq.s32.totalorder %v3485_v57, %v2580_v37  ;;  %vm1075_vm9 = vcmp.eq.s32.totalorder %v3488_v36, %v2580_v37 }
 0x13a   : > { %1810 = vmatpush1.bf16.msra.mxu0 %v1760_v45  ;;  %v1010_v32 = vadd.f32 %v956_v8, %v831_v46  ;;  %v1135_v26 = vsel %vm1073_vm8, %v2585_v38, 0.0  ;;  %v1137_v34 = vsel %vm1075_vm9, %v2585_v38, 0.0  ;;  %vm1252_vm10 = vcmp.eq.s32.totalorder %v3485_v57, %v2589_v39 }
 0x13b   : > { %v1012_v13 = vadd.f32 %v958_v49, %v833_v5  ;;  %vm1254_vm11 = vcmp.eq.s32.totalorder %v3488_v36, %v2589_v39  ;;  %v1314_v27 = vsel %vm1252_vm10, %v2609_v47, 0.0  ;;  %vm1431_vm12 = vcmp.eq.s32.totalorder %v3485_v57, %v2613_v48 }
 0x13c   : > { %v1189_v40 = vadd.f32 %v1135_v26, %v1010_v32  ;;  %v1316_v10 = vsel %vm1254_vm11, %v2609_v47, 0.0  ;;  %vm1433_vm13 = vcmp.eq.s32.totalorder %v3488_v36, %v2613_v48  ;;  %v1493_v58 = vsel %vm1431_vm12, %v2618_v51, 0.0 }
 0x13d   : > { %v1191_v52 = vadd.f32 %v1137_v34, %v1012_v13  ;;  %v1495_v16 = vsel %vm1433_vm13, %v2618_v51, 0.0  ;;  %vm1610_vm14 = vcmp.eq.s32.totalorder %v3485_v57, %v2630_v59  ;;  %vm1612_vm15 = vcmp.eq.s32.totalorder %v3488_v36, %v2630_v59 }
 0x13e   : > { %v1368_v63 = vadd.f32 %v1314_v27, %v1189_v40  ;;  %v1672_v0 = vsel %vm1610_vm14, %v2655_v3, 0.0  ;;  %v1674_v14 = vsel %vm1612_vm15, %v2655_v3, 0.0  ;;  %vm410_vm0 = vcmp.eq.s32.totalorder %v3485_v57, %v2638_v62 }
 0x13f   : > { %v1370_v9 = vadd.f32 %v1316_v10, %v1191_v52  ;;  %vm412_vm1 = vcmp.eq.s32.totalorder %v3488_v36, %v2638_v62  ;;  %v472_v29 = vsel %vm410_vm0, %v2663_v4, 0.0  ;;  %vm535_vm2 = vcmp.eq.s32.totalorder %v3485_v57, %v2642_v1 }
 0x140   : > { %v1547_v28 = vadd.f32 %v1493_v58, %v1368_v63  ;;  %v474_v60 = vsel %vm412_vm1, %v2663_v4, 0.0  ;;  %vm537_vm3 = vcmp.eq.s32.totalorder %v3488_v36, %v2642_v1  ;;  %v597_v43 = vsel %vm535_vm2, %v2673_v7, 0.0 }
 0x141   : > { %v1549_v61 = vadd.f32 %v1495_v16, %v1370_v9  ;;  %v599_v44 = vsel %vm537_vm3, %v2673_v7, 0.0  ;;  %v651_v31 = vadd.f32 %v597_v43, %v472_v29  ;;  %vm714_vm4 = vcmp.eq.s32.totalorder %v3485_v57, %v2646_v25 }
 0x142   : > { %v1726_v33 = vadd.f32 %v1672_v0, %v1547_v28  ;;  %v653_v41 = vadd.f32 %v599_v44, %v474_v60  ;;  %vm716_vm5 = vcmp.eq.s32.totalorder %v3488_v36, %v2646_v25  ;;  %v776_v30 = vsel %vm714_vm4, %v2686_v11, 0.0 }
 0x143   : > { %v1728_v45 = vadd.f32 %v1674_v14, %v1549_v61  ;;  %v778_v46 = vsel %vm716_vm5, %v2686_v11, 0.0  ;;  %v830_v8 = vadd.f32 %v776_v30, %v651_v31  ;;  %vm893_vm6 = vcmp.eq.s32.totalorder %v3485_v57, %v2690_v35 }
 0x144   : > { %v832_v5 = vadd.f32 %v778_v46, %v653_v41  ;;  %vm895_vm7 = vcmp.eq.s32.totalorder %v3488_v36, %v2690_v35  ;;  %v955_v49 = vsel %vm893_vm6, %v2697_v42, 0.0  ;;  %vm1072_vm8 = vcmp.eq.s32.totalorder %v3485_v57, %v2701_v12 }
 0x145   : > { %v1763_v32 = vpack.c.bf16 %v1728_v45, %v1726_v33  ;;  %v957_v26 = vsel %vm895_vm7, %v2697_v42, 0.0  ;;  %v1009_v34 = vadd.f32 %v955_v49, %v830_v8  ;;  %vm1074_vm9 = vcmp.eq.s32.totalorder %v3488_v36, %v2701_v12 }
 0x146   : > { %v1011_v13 = vadd.f32 %v957_v26, %v832_v5  ;;  %v1134_v27 = vsel %vm1072_vm8, %v2716_v50, 0.0  ;;  %v1136_v40 = vsel %vm1074_vm9, %v2716_v50, 0.0  ;;  %vm1251_vm10 = vcmp.eq.s32.totalorder %v3485_v57, %v2720_v53 }
 0x147   : > { %1811 = vmatprep.subr.bf16.mxu0 %v1763_v32  ;;  %v1188_v10 = vadd.f32 %v1134_v27, %v1009_v34  ;;  %vm1253_vm11 = vcmp.eq.s32.totalorder %v3488_v36, %v2720_v53  ;;  %v1313_v58 = vsel %vm1251_vm10, %v2725_v54, 0.0  ;;  %vm1430_vm12 = vcmp.eq.s32.totalorder %v3485_v57, %v2729_v55 }
 0x148   : > { %v1190_v52 = vadd.f32 %v1136_v40, %v1011_v13  ;;  %v1315_v16 = vsel %vm1253_vm11, %v2725_v54, 0.0  ;;  %vm1432_vm13 = vcmp.eq.s32.totalorder %v3488_v36, %v2729_v55  ;;  %v1492_v63 = vsel %vm1430_vm12, %v2734_v56, 0.0 }
 0x149   : > { %v1367_v0 = vadd.f32 %v1313_v58, %v1188_v10  ;;  %v1494_v14 = vsel %vm1432_vm13, %v2734_v56, 0.0  ;;  %vm1609_vm14 = vcmp.eq.s32.totalorder %v3485_v57, %v2737_v15  ;;  %vm1611_vm15 = vcmp.eq.s32.totalorder %v3488_v36, %v2737_v15 }
 0x14a   : > { %v1369_v9 = vadd.f32 %v1315_v16, %v1190_v52  ;;  %v1671_v29 = vsel %vm1609_vm14, %v2760_v6, 0.0  ;;  %v1673_v28 = vsel %vm1611_vm15, %v2760_v6, 0.0  ;;  %v3683_v60 = vadd.s32 160, %v2484_v2 }
 0x14b   : > { %v1546_v43 = vadd.f32 %v1492_v63, %v1367_v0  ;;  %v3686_v61 = vadd.s32 168, %v2484_v2  ;;  %v3689_v44 = vadd.s32 176, %v2484_v2  ;;  %v3692_v57 = vadd.s32 184, %v2484_v2 }
 0x14c   : > { %v1548_v31 = vadd.f32 %v1494_v14, %v1369_v9  ;;  %vm415_vm0 = vcmp.eq.s32.totalorder %v3683_v60, %v2522_v17  ;;  %vm540_vm1 = vcmp.eq.s32.totalorder %v3683_v60, %v2530_v19  ;;  %vm719_vm2 = vcmp.eq.s32.totalorder %v3683_v60, %v2538_v21 }
 0x14d   : > { %v1725_v36 = vadd.f32 %v1671_v29, %v1546_v43  ;;  %vm417_vm3 = vcmp.eq.s32.totalorder %v3686_v61, %v2522_v17  ;;  %v477_v33 = vsel %vm415_vm0, %v2526_v18, 0.0  ;;  %vm542_vm4 = vcmp.eq.s32.totalorder %v3686_v61, %v2530_v19 }
 0x14e   : > { %v1727_v41 = vadd.f32 %v1673_v28, %v1548_v31  ;;  %v479_v30 = vsel %vm417_vm3, %v2526_v18, 0.0  ;;  %v602_v45 = vsel %vm540_vm1, %v2534_v20, 0.0  ;;  %v604_v46 = vsel %vm542_vm4, %v2534_v20, 0.0 }
 0x14f   : > { %v656_v8 = vadd.f32 %v602_v45, %v477_v33  ;;  %v658_v5 = vadd.f32 %v604_v46, %v479_v30  ;;  %vm721_vm5 = vcmp.eq.s32.totalorder %v3686_v61, %v2538_v21  ;;  %v781_v49 = vsel %vm719_vm2, %v2543_v22, 0.0 }
 0x150   : > { %v1762_v32 = vpack.c.bf16 %v1727_v41, %v1725_v36  ;;  %v783_v26 = vsel %vm721_vm5, %v2543_v22, 0.0  ;;  %vm898_vm6 = vcmp.eq.s32.totalorder %v3683_v60, %v2547_v23  ;;  %vm900_vm7 = vcmp.eq.s32.totalorder %v3686_v61, %v2547_v23 }
 0x151   : > { %v835_v34 = vadd.f32 %v781_v49, %v656_v8  ;;  %v837_v13 = vadd.f32 %v783_v26, %v658_v5  ;;  %v960_v27 = vsel %vm898_vm6, %v2552_v24, 0.0  ;;  %v962_v40 = vsel %vm900_vm7, %v2552_v24, 0.0 }
 0x152   : > { %1812 = vmatpush1.bf16.msra.mxu0 %v1762_v32  ;;  %vm1077_vm8 = vcmp.eq.s32.totalorder %v3683_v60, %v2580_v37  ;;  %vm1079_vm9 = vcmp.eq.s32.totalorder %v3686_v61, %v2580_v37  ;;  %vm1256_vm10 = vcmp.eq.s32.totalorder %v3683_v60, %v2589_v39  ;;  %vm1258_vm11 = vcmp.eq.s32.totalorder %v3686_v61, %v2589_v39 }
 0x153   : > { %v1014_v10 = vadd.f32 %v960_v27, %v835_v34  ;;  %v1016_v58 = vadd.f32 %v962_v40, %v837_v13  ;;  %v1139_v52 = vsel %vm1077_vm8, %v2585_v38, 0.0  ;;  %v1141_v16 = vsel %vm1079_vm9, %v2585_v38, 0.0 }
 0x154   : > { %v1318_v63 = vsel %vm1256_vm10, %v2609_v47, 0.0  ;;  %v1320_v0 = vsel %vm1258_vm11, %v2609_v47, 0.0  ;;  %vm1435_vm12 = vcmp.eq.s32.totalorder %v3683_v60, %v2613_v48  ;;  %vm1437_vm13 = vcmp.eq.s32.totalorder %v3686_v61, %v2613_v48 }
 0x155   : > { %v1193_v14 = vadd.f32 %v1139_v52, %v1014_v10  ;;  %v1195_v9 = vadd.f32 %v1141_v16, %v1016_v58  ;;  %v1497_v29 = vsel %vm1435_vm12, %v2618_v51, 0.0  ;;  %v1499_v28 = vsel %vm1437_vm13, %v2618_v51, 0.0 }
 0x156   : > { %vm1614_vm14 = vcmp.eq.s32.totalorder %v3683_v60, %v2630_v59  ;;  %vm1616_vm15 = vcmp.eq.s32.totalorder %v3686_v61, %v2630_v59  ;;  %vm414_vm0 = vcmp.eq.s32.totalorder %v3683_v60, %v2638_v62  ;;  %vm416_vm1 = vcmp.eq.s32.totalorder %v3686_v61, %v2638_v62 }
 0x157   : > { %v1372_v43 = vadd.f32 %v1318_v63, %v1193_v14  ;;  %v1374_v31 = vadd.f32 %v1320_v0, %v1195_v9  ;;  %v1676_v36 = vsel %vm1614_vm14, %v2655_v3, 0.0  ;;  %v1678_v33 = vsel %vm1616_vm15, %v2655_v3, 0.0 }
 0x158   : > { %v476_v41 = vsel %vm414_vm0, %v2663_v4, 0.0  ;;  %v478_v30 = vsel %vm416_vm1, %v2663_v4, 0.0  ;;  %vm539_vm2 = vcmp.eq.s32.totalorder %v3683_v60, %v2642_v1  ;;  %vm541_vm3 = vcmp.eq.s32.totalorder %v3686_v61, %v2642_v1 }
 0x159   : > { %v1551_v45 = vadd.f32 %v1497_v29, %v1372_v43  ;;  %v1553_v46 = vadd.f32 %v1499_v28, %v1374_v31  ;;  %v601_v8 = vsel %vm539_vm2, %v2673_v7, 0.0  ;;  %v603_v5 = vsel %vm541_vm3, %v2673_v7, 0.0 }
 0x15a   : > { %v655_v49 = vadd.f32 %v601_v8, %v476_v41  ;;  %v657_v32 = vadd.f32 %v603_v5, %v478_v30  ;;  %vm718_vm4 = vcmp.eq.s32.totalorder %v3683_v60, %v2646_v25  ;;  %vm720_vm5 = vcmp.eq.s32.totalorder %v3686_v61, %v2646_v25 }
 0x15b   : > { %v1730_v26 = vadd.f32 %v1676_v36, %v1551_v45  ;;  %v1732_v34 = vadd.f32 %v1678_v33, %v1553_v46  ;;  %v780_v13 = vsel %vm718_vm4, %v2686_v11, 0.0  ;;  %v782_v27 = vsel %vm720_vm5, %v2686_v11, 0.0 }
 0x15c   : > { %v834_v40 = vadd.f32 %v780_v13, %v655_v49  ;;  %v836_v10 = vadd.f32 %v782_v27, %v657_v32  ;;  %vm897_vm6 = vcmp.eq.s32.totalorder %v3683_v60, %v2690_v35  ;;  %vm899_vm7 = vcmp.eq.s32.totalorder %v3686_v61, %v2690_v35 }
 0x15d   : > { %v1765_v58 = vpack.c.bf16 %v1732_v34, %v1730_v26  ;;  %v959_v52 = vsel %vm897_vm6, %v2697_v42, 0.0  ;;  %v961_v16 = vsel %vm899_vm7, %v2697_v42, 0.0  ;;  %vm1076_vm8 = vcmp.eq.s32.totalorder %v3683_v60, %v2701_v12 }
 0x15e   : > { %v1013_v63 = vadd.f32 %v959_v52, %v834_v40  ;;  %v1015_v0 = vadd.f32 %v961_v16, %v836_v10  ;;  %vm1078_vm9 = vcmp.eq.s32.totalorder %v3686_v61, %v2701_v12  ;;  %v1138_v14 = vsel %vm1076_vm8, %v2716_v50, 0.0 }
 0x15f   : > { %1813 = vmatprep.subr.bf16.mxu0 %v1765_v58  ;;  %v1140_v9 = vsel %vm1078_vm9, %v2716_v50, 0.0  ;;  %vm1255_vm10 = vcmp.eq.s32.totalorder %v3683_v60, %v2720_v53  ;;  %vm1257_vm11 = vcmp.eq.s32.totalorder %v3686_v61, %v2720_v53  ;;  %vm1434_vm12 = vcmp.eq.s32.totalorder %v3683_v60, %v2729_v55 }
 0x160   : > { %v1192_v29 = vadd.f32 %v1138_v14, %v1013_v63  ;;  %v1194_v28 = vadd.f32 %v1140_v9, %v1015_v0  ;;  %v1317_v43 = vsel %vm1255_vm10, %v2725_v54, 0.0  ;;  %v1319_v31 = vsel %vm1257_vm11, %v2725_v54, 0.0 }
 0x161   : > { %vm1436_vm13 = vcmp.eq.s32.totalorder %v3686_v61, %v2729_v55  ;;  %v1496_v36 = vsel %vm1434_vm12, %v2734_v56, 0.0  ;;  %vm1613_vm14 = vcmp.eq.s32.totalorder %v3683_v60, %v2737_v15  ;;  %vm1615_vm15 = vcmp.eq.s32.totalorder %v3686_v61, %v2737_v15 }
 0x162   : > { %v1371_v33 = vadd.f32 %v1317_v43, %v1192_v29  ;;  %v1373_v41 = vadd.f32 %v1319_v31, %v1194_v28  ;;  %v1498_v30 = vsel %vm1436_vm13, %v2734_v56, 0.0  ;;  %v1675_v45 = vsel %vm1613_vm14, %v2760_v6, 0.0 }
 0x163   : > { %v1677_v46 = vsel %vm1615_vm15, %v2760_v6, 0.0  ;;  %vm419_vm0 = vcmp.eq.s32.totalorder %v3689_v44, %v2522_v17  ;;  %vm421_vm1 = vcmp.eq.s32.totalorder %v3692_v57, %v2522_v17  ;;  %vm544_vm2 = vcmp.eq.s32.totalorder %v3689_v44, %v2530_v19 }
 0x164   : > { %v1550_v60 = vadd.f32 %v1496_v36, %v1371_v33  ;;  %v1552_v8 = vadd.f32 %v1498_v30, %v1373_v41  ;;  %v481_v61 = vsel %vm419_vm0, %v2526_v18, 0.0  ;;  %v483_v5 = vsel %vm421_vm1, %v2526_v18, 0.0 }
 0x165   : > { %vm546_vm3 = vcmp.eq.s32.totalorder %v3692_v57, %v2530_v19  ;;  %v606_v49 = vsel %vm544_vm2, %v2534_v20, 0.0  ;;  %vm723_vm4 = vcmp.eq.s32.totalorder %v3689_v44, %v2538_v21  ;;  %vm725_vm5 = vcmp.eq.s32.totalorder %v3692_v57, %v2538_v21 }
 0x166   : > { %v1729_v32 = vadd.f32 %v1675_v45, %v1550_v60  ;;  %v1731_v26 = vadd.f32 %v1677_v46, %v1552_v8  ;;  %v608_v34 = vsel %vm546_vm3, %v2534_v20, 0.0  ;;  %v660_v13 = vadd.f32 %v606_v49, %v481_v61 }
 0x167   : > { %v662_v27 = vadd.f32 %v608_v34, %v483_v5  ;;  %v785_v40 = vsel %vm723_vm4, %v2543_v22, 0.0  ;;  %v787_v10 = vsel %vm725_vm5, %v2543_v22, 0.0  ;;  %vm902_vm6 = vcmp.eq.s32.totalorder %v3689_v44, %v2547_v23 }
 0x168   : > { %v1764_v58 = vpack.c.bf16 %v1731_v26, %v1729_v32  ;;  %v839_v52 = vadd.f32 %v785_v40, %v660_v13  ;;  %vm904_vm7 = vcmp.eq.s32.totalorder %v3692_v57, %v2547_v23  ;;  %v964_v16 = vsel %vm902_vm6, %v2552_v24, 0.0 }
 0x169   : > { %v841_v63 = vadd.f32 %v787_v10, %v662_v27  ;;  %v966_v0 = vsel %vm904_vm7, %v2552_v24, 0.0  ;;  %vm1081_vm8 = vcmp.eq.s32.totalorder %v3689_v44, %v2580_v37  ;;  %vm1083_vm9 = vcmp.eq.s32.totalorder %v3692_v57, %v2580_v37 }
 0x16a   : > { %1814 = vmatpush1.bf16.msra.mxu0 %v1764_v58  ;;  %v1018_v14 = vadd.f32 %v964_v16, %v839_v52  ;;  %v1143_v9 = vsel %vm1081_vm8, %v2585_v38, 0.0  ;;  %v1145_v29 = vsel %vm1083_vm9, %v2585_v38, 0.0  ;;  %vm1260_vm10 = vcmp.eq.s32.totalorder %v3689_v44, %v2589_v39 }
 0x16b   : > { %v1020_v28 = vadd.f32 %v966_v0, %v841_v63  ;;  %vm1262_vm11 = vcmp.eq.s32.totalorder %v3692_v57, %v2589_v39  ;;  %v1322_v43 = vsel %vm1260_vm10, %v2609_v47, 0.0  ;;  %vm1439_vm12 = vcmp.eq.s32.totalorder %v3689_v44, %v2613_v48 }
 0x16c   : > { %v1197_v31 = vadd.f32 %v1143_v9, %v1018_v14  ;;  %v1324_v36 = vsel %vm1262_vm11, %v2609_v47, 0.0  ;;  %vm1441_vm13 = vcmp.eq.s32.totalorder %v3692_v57, %v2613_v48  ;;  %v1501_v33 = vsel %vm1439_vm12, %v2618_v51, 0.0 }
 0x16d   : > { %v1199_v41 = vadd.f32 %v1145_v29, %v1020_v28  ;;  %v1503_v30 = vsel %vm1441_vm13, %v2618_v51, 0.0  ;;  %vm1618_vm14 = vcmp.eq.s32.totalorder %v3689_v44, %v2630_v59  ;;  %vm1620_vm15 = vcmp.eq.s32.totalorder %v3692_v57, %v2630_v59 }
 0x16e   : > { %v1376_v45 = vadd.f32 %v1322_v43, %v1197_v31  ;;  %v1680_v46 = vsel %vm1618_vm14, %v2655_v3, 0.0  ;;  %v1682_v60 = vsel %vm1620_vm15, %v2655_v3, 0.0  ;;  %vm418_vm0 = vcmp.eq.s32.totalorder %v3689_v44, %v2638_v62 }
 0x16f   : > { %v1378_v8 = vadd.f32 %v1324_v36, %v1199_v41  ;;  %vm420_vm1 = vcmp.eq.s32.totalorder %v3692_v57, %v2638_v62  ;;  %v480_v61 = vsel %vm418_vm0, %v2663_v4, 0.0  ;;  %vm543_vm2 = vcmp.eq.s32.totalorder %v3689_v44, %v2642_v1 }
 0x170   : > { %v1555_v5 = vadd.f32 %v1501_v33, %v1376_v45  ;;  %v482_v49 = vsel %vm420_vm1, %v2663_v4, 0.0  ;;  %vm545_vm3 = vcmp.eq.s32.totalorder %v3692_v57, %v2642_v1  ;;  %v605_v32 = vsel %vm543_vm2, %v2673_v7, 0.0 }
 0x171   : > { %v1557_v26 = vadd.f32 %v1503_v30, %v1378_v8  ;;  %v607_v34 = vsel %vm545_vm3, %v2673_v7, 0.0  ;;  %v659_v13 = vadd.f32 %v605_v32, %v480_v61  ;;  %vm722_vm4 = vcmp.eq.s32.totalorder %v3689_v44, %v2646_v25 }
 0x172   : > { %v1734_v27 = vadd.f32 %v1680_v46, %v1555_v5  ;;  %v661_v40 = vadd.f32 %v607_v34, %v482_v49  ;;  %vm724_vm5 = vcmp.eq.s32.totalorder %v3692_v57, %v2646_v25  ;;  %v784_v10 = vsel %vm722_vm4, %v2686_v11, 0.0 }
 0x173   : > { %v1736_v58 = vadd.f32 %v1682_v60, %v1557_v26  ;;  %v786_v52 = vsel %vm724_vm5, %v2686_v11, 0.0  ;;  %v838_v16 = vadd.f32 %v784_v10, %v659_v13  ;;  %vm901_vm6 = vcmp.eq.s32.totalorder %v3689_v44, %v2690_v35 }
 0x174   : > { %v840_v63 = vadd.f32 %v786_v52, %v661_v40  ;;  %vm903_vm7 = vcmp.eq.s32.totalorder %v3692_v57, %v2690_v35  ;;  %v963_v0 = vsel %vm901_vm6, %v2697_v42, 0.0  ;;  %vm1080_vm8 = vcmp.eq.s32.totalorder %v3689_v44, %v2701_v12 }
 0x175   : > { %v1767_v14 = vpack.c.bf16 %v1736_v58, %v1734_v27  ;;  %v965_v9 = vsel %vm903_vm7, %v2697_v42, 0.0  ;;  %v1017_v29 = vadd.f32 %v963_v0, %v838_v16  ;;  %vm1082_vm9 = vcmp.eq.s32.totalorder %v3692_v57, %v2701_v12 }
 0x176   : > { %v1019_v28 = vadd.f32 %v965_v9, %v840_v63  ;;  %v1142_v43 = vsel %vm1080_vm8, %v2716_v50, 0.0  ;;  %v1144_v31 = vsel %vm1082_vm9, %v2716_v50, 0.0  ;;  %vm1259_vm10 = vcmp.eq.s32.totalorder %v3689_v44, %v2720_v53 }
 0x177   : > { %1815 = vmatprep.subr.bf16.mxu0 %v1767_v14  ;;  %v1196_v36 = vadd.f32 %v1142_v43, %v1017_v29  ;;  %vm1261_vm11 = vcmp.eq.s32.totalorder %v3692_v57, %v2720_v53  ;;  %v1321_v33 = vsel %vm1259_vm10, %v2725_v54, 0.0  ;;  %vm1438_vm12 = vcmp.eq.s32.totalorder %v3689_v44, %v2729_v55 }
 0x178   : > { %v1198_v41 = vadd.f32 %v1144_v31, %v1019_v28  ;;  %v1323_v30 = vsel %vm1261_vm11, %v2725_v54, 0.0  ;;  %vm1440_vm13 = vcmp.eq.s32.totalorder %v3692_v57, %v2729_v55  ;;  %v1500_v45 = vsel %vm1438_vm12, %v2734_v56, 0.0 }
 0x179   : > { %v1375_v46 = vadd.f32 %v1321_v33, %v1196_v36  ;;  %v1502_v60 = vsel %vm1440_vm13, %v2734_v56, 0.0  ;;  %vm1617_vm14 = vcmp.eq.s32.totalorder %v3689_v44, %v2737_v15  ;;  %vm1619_vm15 = vcmp.eq.s32.totalorder %v3692_v57, %v2737_v15 }
 0x17a   : > { %v1377_v8 = vadd.f32 %v1323_v30, %v1198_v41  ;;  %v1679_v61 = vsel %vm1617_vm14, %v2760_v6, 0.0  ;;  %v3886_v5 = vadd.s32 192, %v2484_v2  ;;  %v1681_v32 = vsel %vm1619_vm15, %v2760_v6, 0.0 }
 0x17b   : > { %v1554_v49 = vadd.f32 %v1500_v45, %v1375_v46  ;;  %v3890_v26 = vadd.s32 200, %v2484_v2  ;;  %v3893_v34 = vadd.s32 208, %v2484_v2 }
 0x17c   : > { %v1556_v13 = vadd.f32 %v1502_v60, %v1377_v8  ;;  %vm423_vm0 = vcmp.eq.s32.totalorder %v3886_v5, %v2522_v17  ;;  %vm548_vm1 = vcmp.eq.s32.totalorder %v3886_v5, %v2530_v19  ;;  %vm727_vm2 = vcmp.eq.s32.totalorder %v3886_v5, %v2538_v21 }
 0x17d   : > { %v1733_v44 = vadd.f32 %v1679_v61, %v1554_v49  ;;  %vm425_vm3 = vcmp.eq.s32.totalorder %v3890_v26, %v2522_v17  ;;  %v485_v57 = vsel %vm423_vm0, %v2526_v18, 0.0  ;;  %vm550_vm4 = vcmp.eq.s32.totalorder %v3890_v26, %v2530_v19 }
 0x17e   : > { %v1735_v2 = vadd.f32 %v1681_v32, %v1556_v13  ;;  %v487_v27 = vsel %vm425_vm3, %v2526_v18, 0.0  ;;  %v610_v40 = vsel %vm548_vm1, %v2534_v20, 0.0  ;;  %v612_v10 = vsel %vm550_vm4, %v2534_v20, 0.0 }
 0x17f   : > { %v664_v58 = vadd.f32 %v610_v40, %v485_v57  ;;  %v666_v52 = vadd.f32 %v612_v10, %v487_v27  ;;  %vm729_vm5 = vcmp.eq.s32.totalorder %v3890_v26, %v2538_v21  ;;  %v789_v16 = vsel %vm727_vm2, %v2543_v22, 0.0 }
 0x180   : > { %v1766_v63 = vpack.c.bf16 %v1735_v2, %v1733_v44  ;;  %v791_v0 = vsel %vm729_vm5, %v2543_v22, 0.0  ;;  %vm906_vm6 = vcmp.eq.s32.totalorder %v3886_v5, %v2547_v23  ;;  %vm908_vm7 = vcmp.eq.s32.totalorder %v3890_v26, %v2547_v23 }
 0x181   : > { %v843_v14 = vadd.f32 %v789_v16, %v664_v58  ;;  %v845_v9 = vadd.f32 %v791_v0, %v666_v52  ;;  %v968_v29 = vsel %vm906_vm6, %v2552_v24, 0.0  ;;  %v970_v28 = vsel %vm908_vm7, %v2552_v24, 0.0 }
 0x182   : > { %1816 = vmatpush1.bf16.msra.mxu0 %v1766_v63  ;;  %vm1085_vm8 = vcmp.eq.s32.totalorder %v3886_v5, %v2580_v37  ;;  %vm1087_vm9 = vcmp.eq.s32.totalorder %v3890_v26, %v2580_v37  ;;  %vm1264_vm10 = vcmp.eq.s32.totalorder %v3886_v5, %v2589_v39  ;;  %vm1266_vm11 = vcmp.eq.s32.totalorder %v3890_v26, %v2589_v39 }
 0x183   : > { %v1022_v43 = vadd.f32 %v968_v29, %v843_v14  ;;  %v1024_v31 = vadd.f32 %v970_v28, %v845_v9  ;;  %v1147_v36 = vsel %vm1085_vm8, %v2585_v38, 0.0  ;;  %v1149_v33 = vsel %vm1087_vm9, %v2585_v38, 0.0 }
 0x184   : > { %v1326_v41 = vsel %vm1264_vm10, %v2609_v47, 0.0  ;;  %v1328_v30 = vsel %vm1266_vm11, %v2609_v47, 0.0  ;;  %vm1443_vm12 = vcmp.eq.s32.totalorder %v3886_v5, %v2613_v48  ;;  %vm1445_vm13 = vcmp.eq.s32.totalorder %v3890_v26, %v2613_v48 }
 0x185   : > { %v1201_v45 = vadd.f32 %v1147_v36, %v1022_v43  ;;  %v1203_v46 = vadd.f32 %v1149_v33, %v1024_v31  ;;  %v1505_v60 = vsel %vm1443_vm12, %v2618_v51, 0.0  ;;  %v1507_v8 = vsel %vm1445_vm13, %v2618_v51, 0.0 }
 0x186   : > { %vm1622_vm14 = vcmp.eq.s32.totalorder %v3886_v5, %v2630_v59  ;;  %vm1624_vm15 = vcmp.eq.s32.totalorder %v3890_v26, %v2630_v59  ;;  %vm422_vm0 = vcmp.eq.s32.totalorder %v3886_v5, %v2638_v62  ;;  %vm424_vm1 = vcmp.eq.s32.totalorder %v3890_v26, %v2638_v62 }
 0x187   : > { %v1380_v61 = vadd.f32 %v1326_v41, %v1201_v45  ;;  %v1382_v49 = vadd.f32 %v1328_v30, %v1203_v46  ;;  %v1684_v32 = vsel %vm1622_vm14, %v2655_v3, 0.0  ;;  %v1686_v13 = vsel %vm1624_vm15, %v2655_v3, 0.0 }
 0x188   : > { %v484_v44 = vsel %vm422_vm0, %v2663_v4, 0.0  ;;  %v486_v57 = vsel %vm424_vm1, %v2663_v4, 0.0  ;;  %vm547_vm2 = vcmp.eq.s32.totalorder %v3886_v5, %v2642_v1  ;;  %vm549_vm3 = vcmp.eq.s32.totalorder %v3890_v26, %v2642_v1 }
 0x189   : > { %v1559_v2 = vadd.f32 %v1505_v60, %v1380_v61  ;;  %v1561_v27 = vadd.f32 %v1507_v8, %v1382_v49  ;;  %v609_v40 = vsel %vm547_vm2, %v2673_v7, 0.0  ;;  %v611_v10 = vsel %vm549_vm3, %v2673_v7, 0.0 }
 0x18a   : > { %v663_v58 = vadd.f32 %v609_v40, %v484_v44  ;;  %v665_v52 = vadd.f32 %v611_v10, %v486_v57  ;;  %vm726_vm4 = vcmp.eq.s32.totalorder %v3886_v5, %v2646_v25  ;;  %vm728_vm5 = vcmp.eq.s32.totalorder %v3890_v26, %v2646_v25 }
 0x18b   : > { %v1738_v16 = vadd.f32 %v1684_v32, %v1559_v2  ;;  %v1740_v63 = vadd.f32 %v1686_v13, %v1561_v27  ;;  %v788_v0 = vsel %vm726_vm4, %v2686_v11, 0.0  ;;  %v790_v14 = vsel %vm728_vm5, %v2686_v11, 0.0 }
 0x18c   : > { %v842_v9 = vadd.f32 %v788_v0, %v663_v58  ;;  %v844_v29 = vadd.f32 %v790_v14, %v665_v52  ;;  %vm905_vm6 = vcmp.eq.s32.totalorder %v3886_v5, %v2690_v35  ;;  %vm907_vm7 = vcmp.eq.s32.totalorder %v3890_v26, %v2690_v35 }
 0x18d   : > { %v1769_v28 = vpack.c.bf16 %v1740_v63, %v1738_v16  ;;  %v967_v43 = vsel %vm905_vm6, %v2697_v42, 0.0  ;;  %v969_v31 = vsel %vm907_vm7, %v2697_v42, 0.0  ;;  %vm1084_vm8 = vcmp.eq.s32.totalorder %v3886_v5, %v2701_v12 }
 0x18e   : > { %v1021_v36 = vadd.f32 %v967_v43, %v842_v9  ;;  %v1023_v33 = vadd.f32 %v969_v31, %v844_v29  ;;  %vm1086_vm9 = vcmp.eq.s32.totalorder %v3890_v26, %v2701_v12  ;;  %v1146_v41 = vsel %vm1084_vm8, %v2716_v50, 0.0  ;;  %v1838_v43 = vld [vmem:[%s1837_s6] sm:$0xf] }
 0x18f   : > { %1817 = vmatprep.subr.bf16.mxu0 %v1769_v28  ;;  %v1148_v30 = vsel %vm1086_vm9, %v2716_v50, 0.0  ;;  %vm1263_vm10 = vcmp.eq.s32.totalorder %v3886_v5, %v2720_v53  ;;  %vm1265_vm11 = vcmp.eq.s32.totalorder %v3890_v26, %v2720_v53  ;;  %vm1442_vm12 = vcmp.eq.s32.totalorder %v3886_v5, %v2729_v55  ;;  %v1834_v31 = vld [vmem:[#allocation2] sm:$0xff] }
 0x190   : > { %v1200_v45 = vadd.f32 %v1146_v41, %v1021_v36  ;;  %v1202_v46 = vadd.f32 %v1148_v30, %v1023_v33  ;;  %v1325_v60 = vsel %vm1263_vm10, %v2725_v54, 0.0  ;;  %v1327_v8 = vsel %vm1265_vm11, %v2725_v54, 0.0  ;;  %v1835_v36 = vld [vmem:[#allocation2 + $0x8] sm:$0xff] }
 0x191   : > { %vm1444_vm13 = vcmp.eq.s32.totalorder %v3890_v26, %v2729_v55  ;;  %v1504_v61 = vsel %vm1442_vm12, %v2734_v56, 0.0  ;;  %vm1621_vm14 = vcmp.eq.s32.totalorder %v3886_v5, %v2737_v15  ;;  %vm1623_vm15 = vcmp.eq.s32.totalorder %v3890_v26, %v2737_v15 }
 0x192   : > { %v1379_v49 = vadd.f32 %v1325_v60, %v1200_v45  ;;  %v1381_v32 = vadd.f32 %v1327_v8, %v1202_v46  ;;  %v1506_v13 = vsel %vm1444_vm13, %v2734_v56, 0.0  ;;  %v1683_v44 = vsel %vm1621_vm14, %v2760_v6, 0.0  ;;  %v1903_v8 = vld [vmem:[%s4107_s4] sm:$0xff] (!%p2071_p11) }
 0x193   : > { %v1685_v57 = vsel %vm1623_vm15, %v2760_v6, 0.0  ;;  %vm427_vm0 = vcmp.eq.s32.totalorder %v3893_v34, %v2522_v17  ;;  %vm552_vm1 = vcmp.eq.s32.totalorder %v3893_v34, %v2530_v19  ;;  %vm731_vm2 = vcmp.eq.s32.totalorder %v3893_v34, %v2538_v21 }
 0x194   : > { %v1558_v5 = vadd.f32 %v1504_v61, %v1379_v49  ;;  %v1560_v2 = vadd.f32 %v1506_v13, %v1381_v32  ;;  %v489_v26 = vsel %vm427_vm0, %v2526_v18, 0.0  ;;  %v614_v27 = vsel %vm552_vm1, %v2534_v20, 0.0 }
 0x195   : > { %v668_v40 = vadd.f32 %v614_v27, %v489_v26  ;;  %v793_v10 = vsel %vm731_vm2, %v2543_v22, 0.0  ;;  %vm910_vm3 = vcmp.eq.s32.totalorder %v3893_v34, %v2547_v23  ;;  %vm1089_vm4 = vcmp.eq.s32.totalorder %v3893_v34, %v2580_v37 }
 0x196   : > { %v1737_v17 = vadd.f32 %v1683_v44, %v1558_v5  ;;  %v1739_v19 = vadd.f32 %v1685_v57, %v1560_v2  ;;  %v972_v58 = vsel %vm910_vm3, %v2552_v24, 0.0  ;;  %vm1268_vm5 = vcmp.eq.s32.totalorder %v3893_v34, %v2589_v39 }
 0x197   : > { %v847_v21 = vadd.f32 %v793_v10, %v668_v40  ;;  %v1151_v20 = vsel %vm1089_vm4, %v2585_v38, 0.0  ;;  %v1330_v22 = vsel %vm1268_vm5, %v2609_v47, 0.0  ;;  %vm1447_vm6 = vcmp.eq.s32.totalorder %v3893_v34, %v2613_v48  ;;  %v2065_v48 = vld.sshfl [vmem:[%s2474_s9] sm:$0x33 pattern:$0x76325410] }
 0x198   : > { %v1768_v18 = vpack.c.bf16 %v1739_v19, %v1737_v17  ;;  %vm426_vm7 = vcmp.eq.s32.totalorder %v3893_v34, %v2638_v62  ;;  %vm551_vm8 = vcmp.eq.s32.totalorder %v3893_v34, %v2642_v1  ;;  %vm730_vm9 = vcmp.eq.s32.totalorder %v3893_v34, %v2646_v25 }
 0x199   : > { %v1026_v23 = vadd.f32 %v972_v58, %v847_v21  ;;  %v488_v24 = vsel %vm426_vm7, %v2663_v4, 0.0  ;;  %v613_v37 = vsel %vm551_vm8, %v2673_v7, 0.0  ;;  %v792_v38 = vsel %vm730_vm9, %v2686_v11, 0.0 }
 0x19a   : > { %1818 = vmatpush1.bf16.msra.mxu0 %v1768_v18  ;;  %vm909_vm10 = vcmp.eq.s32.totalorder %v3893_v34, %v2690_v35  ;;  %vm1626_vm11 = vcmp.eq.s32.totalorder %v3893_v34, %v2630_v59  ;;  %v667_v47 = vadd.f32 %v613_v37, %v488_v24  ;;  %vm1088_vm12 = vcmp.eq.s32.totalorder %v3893_v34, %v2701_v12 }
 0x19b   : > { %v1205_v39 = vadd.f32 %v1151_v20, %v1026_v23  ;;  %v1509_v62 = vsel %vm1447_vm6, %v2618_v51, 0.0  ;;  %v971_v1 = vsel %vm909_vm10, %v2697_v42, 0.0  ;;  %vm1267_vm13 = vcmp.eq.s32.totalorder %v3893_v34, %v2720_v53 }
 0x19c   : > { %v846_v4 = vadd.f32 %v792_v38, %v667_v47  ;;  %v1688_v7 = vsel %vm1626_vm11, %v2655_v3, 0.0  ;;  %v1150_v11 = vsel %vm1088_vm12, %v2716_v50, 0.0  ;;  %v1780_v35 = vcombine.high %v2065_v48, %v2065_v48 }
 0x19d   : > { %v1384_v25 = vadd.f32 %v1330_v22, %v1205_v39  ;;  %vm1782_vm14 = vcmask 719872   ;;  %vm1446_vm15 = vcmp.eq.s32.totalorder %v3893_v34, %v2729_v55  ;;  %v1329_v51 = vsel %vm1267_vm13, %v2725_v54, 0.0 }
 0x19e   : > { %v1025_v52 = vadd.f32 %v971_v1, %v846_v4  ;;  %2067 = vmatprep.mubr.msk.bf16.mxu0 %vm1782_vm14, %v1780_v35  ;;  %vm1625_vm0 = vcmp.eq.s32.totalorder %v3893_v34, %v2737_v15  ;;  %vm1786_vm1 = vcmask 1043456   ;;  %v1508_v3 = vsel %vm1446_vm15, %v2734_v56, 0.0 }
 0x19f   : > { %v1563_v59 = vadd.f32 %v1509_v62, %v1384_v25  ;;  %v1687_v16 = vsel %vm1625_vm0, %v2760_v6, 0.0  ;;  %v2302_v54 = vmov 0   ;;  %vm1845_vm2 = vcmask 1041408  }
 0x1a0   : > { %v1204_v12 = vadd.f32 %v1150_v11, %v1025_v52  ;;  %1884 = vmatprep.mubr.bf16.mxu1 %v2302_v54  ;;  %vm1841_vm3 = vcmask 31744   ;;  %v2303_v61 = vmov (!%p2071_p11), 0  }
 0x1a1   : > { %v1742_v42 = vadd.f32 %v1688_v7, %v1563_v59  ;;  %2167 = vset.pattern.permute.xlu0 (!%p2071_p11), %v2303_v61 }
 0x1a2   : > { %v1383_v53 = vadd.f32 %v1329_v51, %v1204_v12  ;;  %1906 = vperm.xlu0 (!%p2071_p11), %2167, %v1903_v8  }
 0x1a3   : > { %v1771_v50 = vpack.c.bf16 %v1742_v42, %v1742_v42 }
 0x1a4   : > { %v1562_v63 = vadd.f32 %v1508_v3, %v1383_v53 }
 0x1a5   : > { %2066 = vmatprep.subr.msk.bf16.mxu0 %vm1786_vm1, %v1771_v50 }
 0x1a6   : > { %v1741_v0 = vadd.f32 %v1687_v16, %v1562_v63 }
 0x1a8   : > { %v1770_v55 = vpack.c.bf16 %v1741_v0, %v1741_v0 }
 0x1aa   : > { %v1788_v14 = vsel %vm1786_vm1, %v1770_v55, 0 }
 0x1ab   : > { %1820 = vmatpush1.bf16.msra.mxu0 %v1788_v14 }
 0x1ae   : > { %1826 = vmatmul.mubr.bf16.vlgmr.msra.gmra.mrb[0].mxu0 %v2065_v48 }
 0x221   : > { %v1907_v13 = vpop.permute.xlu0 (!%p2071_p11), %1906 }
 0x281   : > { %v1827_v9 = vpop.f32.mrb[0].mxu0 }
 0x282   : > { %v1839_v15 = vpack.c.bf16 %v1827_v9, %v1827_v9  ;;  %v1829_v34 = vpop.f32.mrb[1].mxu0 }
 0x283   : > { %v1840_v29 = vpack.c.bf16 %v1829_v34, %v1829_v34  ;;  %v1831_v56 = vpop.f32.mrb[2].mxu0 }
 0x284   : > { %v1832_v6 = vpop.f32.mrb[3].mxu0  ;;  %v1847_v28 = vsel %vm1845_vm2, %v1839_v15, 0 }
 0x285   : > { %2069 = vmatprep.subr.msk.bf16.mxu1 %vm1845_vm2, %v1840_v29 }
 0x286   : > { %1853 = vmatpush1.bf16.msra.mxu1 %v1847_v28 }
 0x289   : > { %2070 = vmatmul.mubr.msk.bf16.vlgmr.msra.gmra.mrb[0].mxu1 %vm1841_vm3, %v1838_v43 }
 0x35a   : > { %1900 = sbr.rel (%p2071_p11) target bundleno = 875 (0x36b), region = 52 }
 0x35c   : > { %v1886_v33 = vpop.f32.mrb[0].mxu1 }
 0x35d   : > { %v1893_v41 = vadd.f32 %v1886_v33, %v1834_v31  ;;  %v1888_v30 = vpop.f32.mrb[1].mxu1 }
 0x35e   : > { %v1894_v45 = vadd.f32 %v1888_v30, %v1835_v36  ;;  %v1890_v46 = vpop.f32.mrb[2].mxu1 }
 0x35f   : > { %1895 = vst [vmem:[#allocation2] sm:$0xff] %v1893_v41  ;;  %v1891_v60 = vpop.f32.mrb[3].mxu1 }
 0x360   : > { %1896 = vst [vmem:[#allocation2 + $0x8] sm:$0xff] %v1894_v45 }
 0x366   : > { %v1901_v49 = vld [vmem:[#allocation2] sm:$0xff] }
 0x367   : > { %v1902_v32 = vld [vmem:[#allocation2 + $0x8] sm:$0xff]  ;;  %v1909_v44 = vadd.f32 %v1907_v13, %v1901_v49 }
 0x368   : > { %v1910_v57 = vadd.f32 %v1907_v13, %v1902_v32 }
 0x369   : > { %1911 = vst [vmem:[%s2479_s28] sm:$0xff] %v1909_v44 }
 0x36a   : > { %1912 = vst [vmem:[%s2479_s28 + $0x8] sm:$0xff] %v1910_v57 }
 0x36b PF: > { %s2079_s21 = sshll.u32 %s2284_s22, 8  ;;  %s1930_s7 = sshll.u32 %s2479_s28, 4  ;;  %s1931_s7 = int_to_ptr.vmem [resolvable:$true] %s1930_s7 }
 0x36c   : > { %s4054_s13 = scalar_lea.hbm %s4108_s5, %s2079_s21  ;;  %s1914_s11 = scalar_lea.sflag [#allocation5], %s2460_s17 }
 0x36d   : > { %s2198_s26 = scalar_lea.vmem %s1931_s7, 256  ;;  %p4121_p12 = scmp.ne.s32.totalorder %s4116_s8, 0 }
 0x36e   : > { %p2199_p0 = scmp.ne.s32.totalorder %s1931_s7, %s2198_s26  ;;  %s2304_s30 = smov [#allocation6]  }
 0x36f   : > { %s2202_s2 = sshll.u32 %s2304_s30, 4  ;;  %s2203_s2 = int_to_ptr.vmem [resolvable:$false] %s2202_s2 }
 0x370   : > { %p2200_p13 = pnand %p2199_p0, %p4121_p12  ;;  %s2204_s27 = scalar_lea.vmem %s2203_s2, 512 }
 0x371   : > { %p2205_p4 = scmp.lt.s32.totalorder %s1931_s7, %s2203_s2  ;;  %p2206_p6 = scmp.lt.s32.totalorder %s2204_s27, %s2198_s26 }
 0x372   : > { %p2201_p2 = pneg %p2200_p13 }
 0x373   : > { %p2207_p7 = por %p2206_p6, %p2205_p4 }
 0x375   : > { %p2208_p8 = pnand %p2207_p7, %p2201_p2 }
 0x377   : > { %2211 = shalt.err (!%p2208_p8)
}
 0x378   : > { %s2212_s22 = scalar_lea.hbm %s4054_s13, 256  ;;  %s2216_s15 = scalar_lea.hbm %s4108_s5, 512 }
 0x379   : > { %p2213_p1 = scmp.ne.s32.totalorder %s4054_s13, %s2212_s22  ;;  %p2217_p10 = scmp.lt.u32.totalorder %s4054_s13, %s4108_s5 }
 0x37a   : > { %p2218_p9 = scmp.lt.u32.totalorder %s2216_s15, %s2212_s22  ;;  %p2220_p0 = scmp.lt.u32.totalorder %s2212_s22, %s4054_s13 }
 0x37b   : > { %p2214_p3 = pnand %p2213_p1, %p4121_p12 }
 0x37c   : > { %p2219_p11 = por %p2218_p9, %p2217_p10 }
 0x37d   : > { %p2215_p5 = pneg %p2214_p3 }
 0x37e   : > { %p2221_p13 = por %p2220_p0, %p2219_p11 }
 0x380   : > { %p2222_p2 = pnand %p2221_p13, %p2215_p5 }
 0x382   : > { %2225 = shalt.err (!%p2222_p2)
}
 0x383   : > { %2086 = dma.vmem_to_hbm [thread:$0]  (%p4121_p12), %s1931_s7, 256, %s4054_s13, %s1914_s11  }
 0x384 PF: > { %p2097_p4 = scmp.ge.s32.totalorder %s2296_s25, 2  ;;  %s1942_s29 = sand.u32 1, %s2268_s18  }
 0x385   : > { %p4122_p6 = scmp.ne.s32.totalorder %s4117_s10, 0  ;;  %s1943_s21 = scalar_lea.sflag [#allocation5], %s1942_s29 }
 0x387   : > { %p2093_p7 = pnand %p2097_p4, %p4122_p6 }
 0x389   : > { %2263 = dma.done.wait (!%p2093_p7), %s1943_s21, 256  }
 0x38a   : > { %2265 = vsyncadd (!%p2093_p7), %s1943_s21, 4294967040  ;;  %s21_s25 = sadd.s32 1, %s2296_s25   ;;  %s4123_s8 = sld [smem:[#allocation9_spill]] }
 0x38b   : > { %p18_p8 = scmp.ge.s32.totalorder %s21_s25, 56   ;;  %s4124_s9 = sld [smem:[#allocation10_spill]] }
 0x38c   : > { %s4125_s18 = smov %s2272_s19  ;;  %s4126_s19 = smov %s2276_s20 }
 0x38d   : > { %s4127_s20 = smov %s2411_s12  ;;  %s4128_s21 = smov %s2288_s23 }
 0x38e   : > { %s4129_s22 = smov %s2292_s24  ;;  %20 = sbr.rel (!%p18_p8) target bundleno = 9 (0x9), region = 102 }
 0x390   : > { %s4130_s23 = smov %s4123_s8 }
 0x391   : > { %s4131_s24 = smov %s4124_s9 }
 0x395   :  { %1948 = vsyncpa [#allocation4], 1 }
 0x396   :  { %1950 = vsyncpa [#allocation4 + $0x1], 1 }
 0x397   :  { %1951 = vsyncpa [#allocation5], 1 }
 0x398   :  { %1953 = vsyncpa [#allocation5 + $0x1], 1 }

</bundles_post_ra>
